<compile_context>
chip_gen: v7x
topology: tpu7x:2x2x1
jax: 0.10.0
libtpu: 0.0.40
codegen_flags: <defaults>
</compile_context>

<pallas_src>
import functools

import jax
import jax.numpy as jnp
from jax.experimental import pallas as pl
from jax.experimental.pallas import tpu as pltpu


# ---------------------------------------------------------------------------
# Pallas kernel: whole BiLSTM recurrence + final fc for one batch tile.
# ---------------------------------------------------------------------------
def bilstm_kernel(x_ref, wx_ref, b_ref, wh_ref, wfcf_ref, wfcb_ref, bfc_ref,
                  out_ref, gsel_ref, *, seq_len, b_tile, hidden_p):
    T, B, H = seq_len, b_tile, hidden_p

    # Hoisted input projection (off the serial path).  The direction select is
    # baked into x/wx by the wrapper, so gsel[t*B:(t+1)*B] already holds the
    # gate-major, direction-interleaved pre-activations
    # [i_f i_b f_f f_b o_f o_b g_f g_b] for forward time t / backward time T-1-t.
    gsel_ref[...] = (
        jnp.dot(x_ref[...], wx_ref[...], preferred_element_type=jnp.float32)
        + b_ref[...])

    wh = wh_ref[...]          # (2H, 8H) bf16, VMEM-resident across the loop
    # TODO(synk): for long sequences hold wh in the MXU weight staging regs via
    # pltpu.matmul_push_rhs / matmul_acc_lhs instead of re-supplying it per step.

    def cell(row, h_cat, c_cat):
        gates = (gsel_ref[pl.ds(row, B), :]
                 + jnp.dot(h_cat, wh, preferred_element_type=jnp.float32))
        sig = jax.nn.sigmoid(gates[:, :6 * H])        # one EUP pass: i, f, o
        g = jnp.tanh(gates[:, 6 * H:])                # one EUP pass: g
        i = sig[:, 0 * H:2 * H]
        f = sig[:, 2 * H:4 * H]
        o = sig[:, 4 * H:6 * H]
        c_new = f * c_cat + i * g
        h_new = (o * jnp.tanh(c_new)).astype(jnp.bfloat16)   # h carried in bf16
        return h_new, c_new

    h0 = jnp.zeros((B, 2 * H), jnp.bfloat16)
    c0 = jnp.zeros((B, 2 * H), jnp.float32)

    # Peel t=0: the backward hidden needed for output[-1] (original time T-1)
    # is produced by the backward direction's FIRST step.
    h, c = cell(0, h0, c0)
    hb_last = h[:, H:]

    def body(t, hc):
        return cell(pl.multiple_of(t * B, B), hc[0], hc[1])

    h, _ = jax.lax.fori_loop(1, T, body, (h, c),
                             unroll=min(8, max(T - 1, 1)))

    # fc(concat(h_fwd_final, h_bwd_at_T-1)) as two lane-aligned matmuls.
    out_ref[...] = (
        jnp.dot(h[:, :H], wfcf_ref[...], preferred_element_type=jnp.float32)
        + jnp.dot(hb_last, wfcb_ref[...], preferred_element_type=jnp.float32)
        + bfc_ref[...])


# ---------------------------------------------------------------------------
# Wrapper
# ---------------------------------------------------------------------------
def _pick_batch_tile(batch, target=128):
    """Largest multiple-of-8 divisor of batch <= target (else whole batch)."""
    best = None
    for cand in range(8, min(batch, target) + 1, 8):
        if batch % cand == 0:
            best = cand
    return best if best is not None else batch


def bilstm_forward(text, params, *, batch_tile=None):
    """text: (T, B) int32 -> (B, output_dim) f32, matching BiLSTM.forward."""
    emb_table = params["embedding"]                       # (V, E)
    # Embedding lookup is a data-dependent gather -> plain JAX glue.
    embedded = jnp.take(emb_table, text, axis=0)          # (T, B, E)
    T, B, E = embedded.shape
    H = params["whh_f"].shape[1]                          # PyTorch layout (4H, H)
    O = params["w_fc"].shape[0]
    Hp = ((H + 63) // 64) * 64                            # 2*Hp = lane-aligned 128

    if batch_tile is None:
        batch_tile = _pick_batch_tile(B)
    assert B % batch_tile == 0
    nbt = B // batch_tile

    gate_order = jnp.array([0, 1, 3, 2])                  # [i f g o] -> [i f o g]

    def prep_gates(w):
        # (n, 4H) -> (n, 4, Hp): gates reordered to [i f o g], H zero-padded.
        n = w.shape[0]
        w4 = w.reshape(n, 4, H)[:, gate_order, :]
        return jnp.pad(w4, ((0, 0), (0, 0), (0, Hp - H)))

    def interleave(wf, wb):
        # -> (n, 8*Hp), gate-major, direction-interleaved:
        # [i_f i_b f_f f_b o_f o_b g_f g_b]
        n = wf.shape[0]
        return jnp.stack([prep_gates(wf), prep_gates(wb)],
                         axis=2).reshape(n, 8 * Hp)

    z_e = jnp.zeros((E, 4 * H), jnp.float32)
    z_h = jnp.zeros((H, 4 * H), jnp.float32)

    # Input-projection weight over [x_t | x_{T-1-t}] (2E wide): the top block
    # only writes forward-direction gate columns, the bottom block only the
    # backward-direction ones -> the direction select is baked into the
    # hoisted precompute (no per-step where()).
    wx = jnp.concatenate([interleave(params["wih_f"].T, z_e),
                          interleave(z_e, params["wih_b"].T)], axis=0)   # (2E, 8Hp)

    def pad_rows(w):                                       # (H, 8Hp) -> (Hp, 8Hp)
        return jnp.pad(w, ((0, Hp - H), (0, 0)))

    # Block-diagonal recurrent weight (the zero blocks keep directions separate).
    wh = jnp.concatenate([pad_rows(interleave(params["whh_f"].T, z_h)),
                          pad_rows(interleave(z_h, params["whh_b"].T))],
                         axis=0)                                          # (2Hp, 8Hp)

    def prep_bias(bv):
        b4 = bv.reshape(4, H)[gate_order, :]
        return jnp.pad(b4, ((0, 0), (0, Hp - H)))

    b = jnp.stack([prep_bias(params["bih_f"] + params["bhh_f"]),
                   prep_bias(params["bih_b"] + params["bhh_b"])],
                  axis=1).reshape(1, 8 * Hp)                              # (1, 8Hp)

    w_fc = params["w_fc"]                                                 # (O, 2H)
    wfc_f = jnp.pad(w_fc[:, :H].T, ((0, Hp - H), (0, 0)))                 # (Hp, O)
    wfc_b = jnp.pad(w_fc[:, H:].T, ((0, Hp - H), (0, 0)))                 # (Hp, O)
    bfc = params["b_fc"].reshape(1, O)                                    # (1, O)

    # bf16 matmul operands; biases and the c state stay f32.
    emb_cat = jnp.concatenate([embedded, embedded[::-1]], axis=-1)        # (T, B, 2E)
    x_tiles = (emb_cat.reshape(T, nbt, batch_tile, 2 * E)
               .transpose(1, 0, 2, 3)
               .reshape(nbt, T * batch_tile, 2 * E)
               .astype(jnp.bfloat16))
    wx = wx.astype(jnp.bfloat16)
    wh = wh.astype(jnp.bfloat16)
    wfc_f = wfc_f.astype(jnp.bfloat16)
    wfc_b = wfc_b.astype(jnp.bfloat16)

    kernel = functools.partial(bilstm_kernel, seq_len=T, b_tile=batch_tile,
                               hidden_p=Hp)

    def full(a):
        return pl.BlockSpec(a.shape, lambda j, nd=a.ndim: (0,) * nd)

    # TODO(synk): for production sizes store gsel in bf16 and chunk the hoisted
    # input projection over T (emit_pipeline) so the scratch fits v7x's 64 MiB
    # VMEM; keep the bias add and c state in f32.
    grid_spec = pltpu.PrefetchScalarGridSpec(
        num_scalar_prefetch=0,
        grid=(nbt,),
        in_specs=[
            pl.BlockSpec((None, T * batch_tile, 2 * E), lambda j: (j, 0, 0)),
            full(wx), full(b), full(wh), full(wfc_f), full(wfc_b), full(bfc),
        ],
        out_specs=pl.BlockSpec((None, batch_tile, O), lambda j: (j, 0, 0)),
        scratch_shapes=[pltpu.VMEM((T * batch_tile, 8 * Hp), jnp.float32)],
    )

    out = pl.pallas_call(
        kernel,
        out_shape=jax.ShapeDtypeStruct((nbt, batch_tile, O), jnp.float32),
        grid_spec=grid_spec,
        compiler_params=pltpu.CompilerParams(
            dimension_semantics=("parallel",),
            vmem_limit_bytes=32 * 1024 * 1024),
    )(x_tiles, wx, b, wh, wfc_f, wfc_b, bfc)
    return out.reshape(B, O)


# ---------------------------------------------------------------------------
# Pure-JAX reference (matches torch.nn.LSTM semantics, f32)
# ---------------------------------------------------------------------------
def bilstm_reference(text, params):
    emb = jnp.take(params["embedding"], text, axis=0)     # (T, B, E)
    T, B, E = emb.shape
    H = params["whh_f"].shape[1]

    def run_dir(xs, wih, whh, bih, bhh):
        def step(carry, x):
            h, c = carry
            gates = x @ wih.T + h @ whh.T + bih + bhh
            i, f, g, o = jnp.split(gates, 4, axis=-1)
            i = jax.nn.sigmoid(i)
            f = jax.nn.sigmoid(f)
            g = jnp.tanh(g)
            o = jax.nn.sigmoid(o)
            c = f * c + i * g
            h = o * jnp.tanh(c)
            return (h, c), h
        init = (jnp.zeros((B, H), jnp.float32), jnp.zeros((B, H), jnp.float32))
        _, hs = jax.lax.scan(step, init, xs)
        return hs

    hs_f = run_dir(emb, params["wih_f"], params["whh_f"],
                   params["bih_f"], params["bhh_f"])
    hs_b = run_dir(emb[::-1], params["wih_b"], params["whh_b"],
                   params["bih_b"], params["bhh_b"])[::-1]
    output = jnp.concatenate([hs_f, hs_b], axis=-1)       # (T, B, 2H)
    return output[-1] @ params["w_fc"].T + params["b_fc"]


# ---------------------------------------------------------------------------
# Main
# ---------------------------------------------------------------------------
if __name__ == "__main__":
    VOCAB, EMB, HID, OUT = 50, 16, 32, 4
    SEQ, BATCH = 8, 16

    key = jax.random.PRNGKey(0)
    ks = jax.random.split(key, 12)
    k_lstm = 1.0 / jnp.sqrt(HID)

    def uni(k, shape, bound):
        return jax.random.uniform(k, shape, jnp.float32, -bound, bound)

    params = {
        "embedding": jax.random.normal(ks[0], (VOCAB, EMB), jnp.float32),
        # PyTorch nn.LSTM parameter layout: weight_ih (4H, E), weight_hh (4H, H)
        "wih_f": uni(ks[1], (4 * HID, EMB), k_lstm),
        "whh_f": uni(ks[2], (4 * HID, HID), k_lstm),
        "bih_f": uni(ks[3], (4 * HID,), k_lstm),
        "bhh_f": uni(ks[4], (4 * HID,), k_lstm),
        "wih_b": uni(ks[5], (4 * HID, EMB), k_lstm),
        "whh_b": uni(ks[6], (4 * HID, HID), k_lstm),
        "bih_b": uni(ks[7], (4 * HID,), k_lstm),
        "bhh_b": uni(ks[8], (4 * HID,), k_lstm),
        # nn.Linear(hidden*2, output): weight (O, 2H), bias (O,)
        "w_fc": uni(ks[9], (OUT, 2 * HID), 1.0 / jnp.sqrt(2 * HID)),
        "b_fc": uni(ks[10], (OUT,), 1.0 / jnp.sqrt(2 * HID)),
    }

    text = jax.random.randint(ks[11], (SEQ, BATCH), 0, VOCAB, dtype=jnp.int32)

    # batch_tile=8 exercises the batch-parallel grid (v7x dual-TC path) at toy size.
    out = jax.block_until_ready(bilstm_forward(text, params, batch_tile=8))
    ref = jax.block_until_ready(bilstm_reference(text, params))

    assert out.shape == (BATCH, OUT)
    # bf16 matmul operands with f32 accumulation vs. an f32 reference.
    assert jnp.allclose(out, ref, atol=2e-2, rtol=2e-2), (
        f"max abs diff {jnp.max(jnp.abs(out - ref))}")

    print("KERNEL_OK")
</pallas_src>

<mosaic_0001>
module attributes {stable_mosaic.version = 11 : i64} {
  func.func @bilstm_kernel(%arg0: i32, %arg1: memref<1x64x32xbf16, #tpu.memory_space<vmem>>, %arg2: memref<32x512xbf16, #tpu.memory_space<vmem>>, %arg3: memref<1x512xf32, #tpu.memory_space<vmem>>, %arg4: memref<128x512xbf16, #tpu.memory_space<vmem>>, %arg5: memref<64x4xbf16, #tpu.memory_space<vmem>>, %arg6: memref<64x4xbf16, #tpu.memory_space<vmem>>, %arg7: memref<1x4xf32, #tpu.memory_space<vmem>>, %arg8: memref<1x8x4xf32, #tpu.memory_space<vmem>>, %arg9: memref<64x512xf32, #tpu.memory_space<vmem>>) attributes {dimension_semantics = [#tpu.dimension_semantics<parallel>], iteration_bounds = array<i64: 2>, scalar_prefetch = 0 : i64, scratch_operands = 1 : i64, tpu.core_type = #tpu.core_type<tc>, window_params = [{transform_indices = @transform_0, window_bounds = array<i64: 1, 64, 32>}, {pipeline_mode = #tpu.pipeline_mode<synchronous>, transform_indices = @transform_1, window_bounds = array<i64: 32, 512>}, {pipeline_mode = #tpu.pipeline_mode<synchronous>, transform_indices = @transform_2, window_bounds = array<i64: 1, 512>}, {pipeline_mode = #tpu.pipeline_mode<synchronous>, transform_indices = @transform_3, window_bounds = array<i64: 128, 512>}, {pipeline_mode = #tpu.pipeline_mode<synchronous>, transform_indices = @transform_4, window_bounds = array<i64: 64, 4>}, {pipeline_mode = #tpu.pipeline_mode<synchronous>, transform_indices = @transform_5, window_bounds = array<i64: 64, 4>}, {pipeline_mode = #tpu.pipeline_mode<synchronous>, transform_indices = @transform_6, window_bounds = array<i64: 1, 4>}, {transform_indices = @transform_7, window_bounds = array<i64: 1, 8, 4>}]} {
    %c0 = arith.constant 0 : index
    %c0_0 = arith.constant 0 : index
    %c0_1 = arith.constant 0 : index
    %0 = vector.load %arg1[%c0, %c0_0, %c0_1] : memref<1x64x32xbf16, #tpu.memory_space<vmem>>, vector<1x64x32xbf16>
    %1 = vector.shape_cast %0 : vector<1x64x32xbf16> to vector<64x32xbf16>
    %c0_2 = arith.constant 0 : index
    %c0_3 = arith.constant 0 : index
    %2 = vector.load %arg2[%c0_2, %c0_3] : memref<32x512xbf16, #tpu.memory_space<vmem>>, vector<32x512xbf16>
    %cst = arith.constant dense<0.000000e+00> : vector<64x512xf32>
    %3 = tpu.matmul %1, %2, %cst {dimension_numbers = #tpu.dot_dimension_numbers<[1], [0], [0], [1], [0, 0, 1, 1], [], []>} : vector<64x32xbf16>, vector<32x512xbf16>, vector<64x512xf32> -> vector<64x512xf32>
    %c0_4 = arith.constant 0 : index
    %c0_5 = arith.constant 0 : index
    %4 = vector.load %arg3[%c0_4, %c0_5] : memref<1x512xf32, #tpu.memory_space<vmem>>, vector<1x512xf32>
    %5 = vector.broadcast %4 : vector<1x512xf32> to vector<64x512xf32>
    %6 = arith.addf %3, %5 : vector<64x512xf32>
    %c0_6 = arith.constant 0 : index
    %c0_7 = arith.constant 0 : index
    %7 = vector.load %arg9[%c0_6, %c0_7] : memref<64x512xf32, #tpu.memory_space<vmem>>, vector<64x512xf32>
    tpu.vector_store %arg9[%c0_6, %c0_7], %6 {strides = array<i32>} : memref<64x512xf32, #tpu.memory_space<vmem>>, vector<64x512xf32>,
    %c0_8 = arith.constant 0 : index
    %c0_9 = arith.constant 0 : index
    %8 = vector.load %arg4[%c0_8, %c0_9] : memref<128x512xbf16, #tpu.memory_space<vmem>>, vector<128x512xbf16>
    %cst_10 = arith.constant 0.000000e+00 : bf16
    %9 = vector.broadcast %cst_10 : bf16 to vector<8x128xbf16>
    %cst_11 = arith.constant 0.000000e+00 : f32
    %10 = vector.broadcast %cst_11 : f32 to vector<8x128xf32>
    %c0_12 = arith.constant 0 : index
    %c0_13 = arith.constant 0 : index
    %11 = vector.load %arg9[%c0_12, %c0_13] : memref<64x512xf32, #tpu.memory_space<vmem>>, vector<8x512xf32>
    %cst_14 = arith.constant dense<0.000000e+00> : vector<8x512xf32>
    %12 = tpu.matmul %9, %8, %cst_14 {dimension_numbers = #tpu.dot_dimension_numbers<[1], [0], [0], [1], [0, 0, 1, 1], [], []>} : vector<8x128xbf16>, vector<128x512xbf16>, vector<8x512xf32> -> vector<8x512xf32>
    %13 = arith.addf %11, %12 : vector<8x512xf32>
    %14 = vector.extract_strided_slice %13 {offsets = [0, 0], sizes = [8, 384], strides = [1, 1]} : vector<8x512xf32> to vector<8x384xf32>
    %15 = arith.negf %14 : vector<8x384xf32>
    %16 = math.exp %15 : vector<8x384xf32>
    %cst_15 = arith.constant 1.000000e+00 : f32
    %17 = vector.broadcast %cst_15 : f32 to vector<8x384xf32>
    %18 = arith.addf %17, %16 : vector<8x384xf32>
    %19 = arith.divf %17, %18 : vector<8x384xf32>
    %20 = vector.extract_strided_slice %13 {offsets = [0, 384], sizes = [8, 128], strides = [1, 1]} : vector<8x512xf32> to vector<8x128xf32>
    %21 = math.tanh %20 : vector<8x128xf32>
    %22 = vector.extract_strided_slice %19 {offsets = [0, 0], sizes = [8, 128], strides = [1, 1]} : vector<8x384xf32> to vector<8x128xf32>
    %23 = vector.extract_strided_slice %19 {offsets = [0, 128], sizes = [8, 128], strides = [1, 1]} : vector<8x384xf32> to vector<8x128xf32>
    %24 = vector.extract_strided_slice %19 {offsets = [0, 256], sizes = [8, 128], strides = [1, 1]} : vector<8x384xf32> to vector<8x128xf32>
    %25 = arith.mulf %23, %10 : vector<8x128xf32>
    %26 = arith.mulf %22, %21 : vector<8x128xf32>
    %27 = arith.addf %25, %26 : vector<8x128xf32>
    %28 = math.tanh %27 : vector<8x128xf32>
    %29 = arith.mulf %24, %28 : vector<8x128xf32>
    %30 = arith.truncf %29 : vector<8x128xf32> to vector<8x128xbf16>
    %31 = vector.extract_strided_slice %30 {offsets = [0, 64], sizes = [8, 64], strides = [1, 1]} : vector<8x128xbf16> to vector<8x64xbf16>
    %c1_i32 = arith.constant 1 : i32
    %c8_i32 = arith.constant 8 : i32
    %32 = arith.muli %c1_i32, %c8_i32 : i32
    %33 = tpu.assume_multiple %32, 8 : i32
    %34 = arith.index_cast %33 : i32 to index
    %c0_16 = arith.constant 0 : index
    %35 = vector.load %arg9[%34, %c0_16] : memref<64x512xf32, #tpu.memory_space<vmem>>, vector<8x512xf32>
    %cst_17 = arith.constant dense<0.000000e+00> : vector<8x512xf32>
    %36 = tpu.matmul %30, %8, %cst_17 {dimension_numbers = #tpu.dot_dimension_numbers<[1], [0], [0], [1], [0, 0, 1, 1], [], []>} : vector<8x128xbf16>, vector<128x512xbf16>, vector<8x512xf32> -> vector<8x512xf32>
    %37 = arith.addf %35, %36 : vector<8x512xf32>
    %38 = vector.extract_strided_slice %37 {offsets = [0, 0], sizes = [8, 384], strides = [1, 1]} : vector<8x512xf32> to vector<8x384xf32>
    %39 = arith.negf %38 : vector<8x384xf32>
    %40 = math.exp %39 : vector<8x384xf32>
    %cst_18 = arith.constant 1.000000e+00 : f32
    %41 = vector.broadcast %cst_18 : f32 to vector<8x384xf32>
    %42 = arith.addf %41, %40 : vector<8x384xf32>
    %43 = arith.divf %41, %42 : vector<8x384xf32>
    %44 = vector.extract_strided_slice %37 {offsets = [0, 384], sizes = [8, 128], strides = [1, 1]} : vector<8x512xf32> to vector<8x128xf32>
    %45 = math.tanh %44 : vector<8x128xf32>
    %46 = vector.extract_strided_slice %43 {offsets = [0, 0], sizes = [8, 128], strides = [1, 1]} : vector<8x384xf32> to vector<8x128xf32>
    %47 = vector.extract_strided_slice %43 {offsets = [0, 128], sizes = [8, 128], strides = [1, 1]} : vector<8x384xf32> to vector<8x128xf32>
    %48 = vector.extract_strided_slice %43 {offsets = [0, 256], sizes = [8, 128], strides = [1, 1]} : vector<8x384xf32> to vector<8x128xf32>
    %49 = arith.mulf %47, %27 : vector<8x128xf32>
    %50 = arith.mulf %46, %45 : vector<8x128xf32>
    %51 = arith.addf %49, %50 : vector<8x128xf32>
    %52 = math.tanh %51 : vector<8x128xf32>
    %53 = arith.mulf %48, %52 : vector<8x128xf32>
    %54 = arith.truncf %53 : vector<8x128xf32> to vector<8x128xbf16>
    %c2_i32 = arith.constant 2 : i32
    %c8_i32_19 = arith.constant 8 : i32
    %55 = arith.muli %c2_i32, %c8_i32_19 : i32
    %56 = tpu.assume_multiple %55, 8 : i32
    %57 = arith.index_cast %56 : i32 to index
    %c0_20 = arith.constant 0 : index
    %58 = vector.load %arg9[%57, %c0_20] : memref<64x512xf32, #tpu.memory_space<vmem>>, vector<8x512xf32>
    %cst_21 = arith.constant dense<0.000000e+00> : vector<8x512xf32>
    %59 = tpu.matmul %54, %8, %cst_21 {dimension_numbers = #tpu.dot_dimension_numbers<[1], [0], [0], [1], [0, 0, 1, 1], [], []>} : vector<8x128xbf16>, vector<128x512xbf16>, vector<8x512xf32> -> vector<8x512xf32>
    %60 = arith.addf %58, %59 : vector<8x512xf32>
    %61 = vector.extract_strided_slice %60 {offsets = [0, 0], sizes = [8, 384], strides = [1, 1]} : vector<8x512xf32> to vector<8x384xf32>
    %62 = arith.negf %61 : vector<8x384xf32>
    %63 = math.exp %62 : vector<8x384xf32>
    %cst_22 = arith.constant 1.000000e+00 : f32
    %64 = vector.broadcast %cst_22 : f32 to vector<8x384xf32>
    %65 = arith.addf %64, %63 : vector<8x384xf32>
    %66 = arith.divf %64, %65 : vector<8x384xf32>
    %67 = vector.extract_strided_slice %60 {offsets = [0, 384], sizes = [8, 128], strides = [1, 1]} : vector<8x512xf32> to vector<8x128xf32>
    %68 = math.tanh %67 : vector<8x128xf32>
    %69 = vector.extract_strided_slice %66 {offsets = [0, 0], sizes = [8, 128], strides = [1, 1]} : vector<8x384xf32> to vector<8x128xf32>
    %70 = vector.extract_strided_slice %66 {offsets = [0, 128], sizes = [8, 128], strides = [1, 1]} : vector<8x384xf32> to vector<8x128xf32>
    %71 = vector.extract_strided_slice %66 {offsets = [0, 256], sizes = [8, 128], strides = [1, 1]} : vector<8x384xf32> to vector<8x128xf32>
    %72 = arith.mulf %70, %51 : vector<8x128xf32>
    %73 = arith.mulf %69, %68 : vector<8x128xf32>
    %74 = arith.addf %72, %73 : vector<8x128xf32>
    %75 = math.tanh %74 : vector<8x128xf32>
    %76 = arith.mulf %71, %75 : vector<8x128xf32>
    %77 = arith.truncf %76 : vector<8x128xf32> to vector<8x128xbf16>
    %c3_i32 = arith.constant 3 : i32
    %c8_i32_23 = arith.constant 8 : i32
    %78 = arith.muli %c3_i32, %c8_i32_23 : i32
    %79 = tpu.assume_multiple %78, 8 : i32
    %80 = arith.index_cast %79 : i32 to index
    %c0_24 = arith.constant 0 : index
    %81 = vector.load %arg9[%80, %c0_24] : memref<64x512xf32, #tpu.memory_space<vmem>>, vector<8x512xf32>
    %cst_25 = arith.constant dense<0.000000e+00> : vector<8x512xf32>
    %82 = tpu.matmul %77, %8, %cst_25 {dimension_numbers = #tpu.dot_dimension_numbers<[1], [0], [0], [1], [0, 0, 1, 1], [], []>} : vector<8x128xbf16>, vector<128x512xbf16>, vector<8x512xf32> -> vector<8x512xf32>
    %83 = arith.addf %81, %82 : vector<8x512xf32>
    %84 = vector.extract_strided_slice %83 {offsets = [0, 0], sizes = [8, 384], strides = [1, 1]} : vector<8x512xf32> to vector<8x384xf32>
    %85 = arith.negf %84 : vector<8x384xf32>
    %86 = math.exp %85 : vector<8x384xf32>
    %cst_26 = arith.constant 1.000000e+00 : f32
    %87 = vector.broadcast %cst_26 : f32 to vector<8x384xf32>
    %88 = arith.addf %87, %86 : vector<8x384xf32>
    %89 = arith.divf %87, %88 : vector<8x384xf32>
    %90 = vector.extract_strided_slice %83 {offsets = [0, 384], sizes = [8, 128], strides = [1, 1]} : vector<8x512xf32> to vector<8x128xf32>
    %91 = math.tanh %90 : vector<8x128xf32>
    %92 = vector.extract_strided_slice %89 {offsets = [0, 0], sizes = [8, 128], strides = [1, 1]} : vector<8x384xf32> to vector<8x128xf32>
    %93 = vector.extract_strided_slice %89 {offsets = [0, 128], sizes = [8, 128], strides = [1, 1]} : vector<8x384xf32> to vector<8x128xf32>
    %94 = vector.extract_strided_slice %89 {offsets = [0, 256], sizes = [8, 128], strides = [1, 1]} : vector<8x384xf32> to vector<8x128xf32>
    %95 = arith.mulf %93, %74 : vector<8x128xf32>
    %96 = arith.mulf %92, %91 : vector<8x128xf32>
    %97 = arith.addf %95, %96 : vector<8x128xf32>
    %98 = math.tanh %97 : vector<8x128xf32>
    %99 = arith.mulf %94, %98 : vector<8x128xf32>
    %100 = arith.truncf %99 : vector<8x128xf32> to vector<8x128xbf16>
    %c4_i32 = arith.constant 4 : i32
    %c8_i32_27 = arith.constant 8 : i32
    %101 = arith.muli %c4_i32, %c8_i32_27 : i32
    %102 = tpu.assume_multiple %101, 8 : i32
    %103 = arith.index_cast %102 : i32 to index
    %c0_28 = arith.constant 0 : index
    %104 = vector.load %arg9[%103, %c0_28] : memref<64x512xf32, #tpu.memory_space<vmem>>, vector<8x512xf32>
    %cst_29 = arith.constant dense<0.000000e+00> : vector<8x512xf32>
    %105 = tpu.matmul %100, %8, %cst_29 {dimension_numbers = #tpu.dot_dimension_numbers<[1], [0], [0], [1], [0, 0, 1, 1], [], []>} : vector<8x128xbf16>, vector<128x512xbf16>, vector<8x512xf32> -> vector<8x512xf32>
    %106 = arith.addf %104, %105 : vector<8x512xf32>
    %107 = vector.extract_strided_slice %106 {offsets = [0, 0], sizes = [8, 384], strides = [1, 1]} : vector<8x512xf32> to vector<8x384xf32>
    %108 = arith.negf %107 : vector<8x384xf32>
    %109 = math.exp %108 : vector<8x384xf32>
    %cst_30 = arith.constant 1.000000e+00 : f32
    %110 = vector.broadcast %cst_30 : f32 to vector<8x384xf32>
    %111 = arith.addf %110, %109 : vector<8x384xf32>
    %112 = arith.divf %110, %111 : vector<8x384xf32>
    %113 = vector.extract_strided_slice %106 {offsets = [0, 384], sizes = [8, 128], strides = [1, 1]} : vector<8x512xf32> to vector<8x128xf32>
    %114 = math.tanh %113 : vector<8x128xf32>
    %115 = vector.extract_strided_slice %112 {offsets = [0, 0], sizes = [8, 128], strides = [1, 1]} : vector<8x384xf32> to vector<8x128xf32>
    %116 = vector.extract_strided_slice %112 {offsets = [0, 128], sizes = [8, 128], strides = [1, 1]} : vector<8x384xf32> to vector<8x128xf32>
    %117 = vector.extract_strided_slice %112 {offsets = [0, 256], sizes = [8, 128], strides = [1, 1]} : vector<8x384xf32> to vector<8x128xf32>
    %118 = arith.mulf %116, %97 : vector<8x128xf32>
    %119 = arith.mulf %115, %114 : vector<8x128xf32>
    %120 = arith.addf %118, %119 : vector<8x128xf32>
    %121 = math.tanh %120 : vector<8x128xf32>
    %122 = arith.mulf %117, %121 : vector<8x128xf32>
    %123 = arith.truncf %122 : vector<8x128xf32> to vector<8x128xbf16>
    %c5_i32 = arith.constant 5 : i32
    %c8_i32_31 = arith.constant 8 : i32
    %124 = arith.muli %c5_i32, %c8_i32_31 : i32
    %125 = tpu.assume_multiple %124, 8 : i32
    %126 = arith.index_cast %125 : i32 to index
    %c0_32 = arith.constant 0 : index
    %127 = vector.load %arg9[%126, %c0_32] : memref<64x512xf32, #tpu.memory_space<vmem>>, vector<8x512xf32>
    %cst_33 = arith.constant dense<0.000000e+00> : vector<8x512xf32>
    %128 = tpu.matmul %123, %8, %cst_33 {dimension_numbers = #tpu.dot_dimension_numbers<[1], [0], [0], [1], [0, 0, 1, 1], [], []>} : vector<8x128xbf16>, vector<128x512xbf16>, vector<8x512xf32> -> vector<8x512xf32>
    %129 = arith.addf %127, %128 : vector<8x512xf32>
    %130 = vector.extract_strided_slice %129 {offsets = [0, 0], sizes = [8, 384], strides = [1, 1]} : vector<8x512xf32> to vector<8x384xf32>
    %131 = arith.negf %130 : vector<8x384xf32>
    %132 = math.exp %131 : vector<8x384xf32>
    %cst_34 = arith.constant 1.000000e+00 : f32
    %133 = vector.broadcast %cst_34 : f32 to vector<8x384xf32>
    %134 = arith.addf %133, %132 : vector<8x384xf32>
    %135 = arith.divf %133, %134 : vector<8x384xf32>
    %136 = vector.extract_strided_slice %129 {offsets = [0, 384], sizes = [8, 128], strides = [1, 1]} : vector<8x512xf32> to vector<8x128xf32>
    %137 = math.tanh %136 : vector<8x128xf32>
    %138 = vector.extract_strided_slice %135 {offsets = [0, 0], sizes = [8, 128], strides = [1, 1]} : vector<8x384xf32> to vector<8x128xf32>
    %139 = vector.extract_strided_slice %135 {offsets = [0, 128], sizes = [8, 128], strides = [1, 1]} : vector<8x384xf32> to vector<8x128xf32>
    %140 = vector.extract_strided_slice %135 {offsets = [0, 256], sizes = [8, 128], strides = [1, 1]} : vector<8x384xf32> to vector<8x128xf32>
    %141 = arith.mulf %139, %120 : vector<8x128xf32>
    %142 = arith.mulf %138, %137 : vector<8x128xf32>
    %143 = arith.addf %141, %142 : vector<8x128xf32>
    %144 = math.tanh %143 : vector<8x128xf32>
    %145 = arith.mulf %140, %144 : vector<8x128xf32>
    %146 = arith.truncf %145 : vector<8x128xf32> to vector<8x128xbf16>
    %c6_i32 = arith.constant 6 : i32
    %c8_i32_35 = arith.constant 8 : i32
    %147 = arith.muli %c6_i32, %c8_i32_35 : i32
    %148 = tpu.assume_multiple %147, 8 : i32
    %149 = arith.index_cast %148 : i32 to index
    %c0_36 = arith.constant 0 : index
    %150 = vector.load %arg9[%149, %c0_36] : memref<64x512xf32, #tpu.memory_space<vmem>>, vector<8x512xf32>
    %cst_37 = arith.constant dense<0.000000e+00> : vector<8x512xf32>
    %151 = tpu.matmul %146, %8, %cst_37 {dimension_numbers = #tpu.dot_dimension_numbers<[1], [0], [0], [1], [0, 0, 1, 1], [], []>} : vector<8x128xbf16>, vector<128x512xbf16>, vector<8x512xf32> -> vector<8x512xf32>
    %152 = arith.addf %150, %151 : vector<8x512xf32>
    %153 = vector.extract_strided_slice %152 {offsets = [0, 0], sizes = [8, 384], strides = [1, 1]} : vector<8x512xf32> to vector<8x384xf32>
    %154 = arith.negf %153 : vector<8x384xf32>
    %155 = math.exp %154 : vector<8x384xf32>
    %cst_38 = arith.constant 1.000000e+00 : f32
    %156 = vector.broadcast %cst_38 : f32 to vector<8x384xf32>
    %157 = arith.addf %156, %155 : vector<8x384xf32>
    %158 = arith.divf %156, %157 : vector<8x384xf32>
    %159 = vector.extract_strided_slice %152 {offsets = [0, 384], sizes = [8, 128], strides = [1, 1]} : vector<8x512xf32> to vector<8x128xf32>
    %160 = math.tanh %159 : vector<8x128xf32>
    %161 = vector.extract_strided_slice %158 {offsets = [0, 0], sizes = [8, 128], strides = [1, 1]} : vector<8x384xf32> to vector<8x128xf32>
    %162 = vector.extract_strided_slice %158 {offsets = [0, 128], sizes = [8, 128], strides = [1, 1]} : vector<8x384xf32> to vector<8x128xf32>
    %163 = vector.extract_strided_slice %158 {offsets = [0, 256], sizes = [8, 128], strides = [1, 1]} : vector<8x384xf32> to vector<8x128xf32>
    %164 = arith.mulf %162, %143 : vector<8x128xf32>
    %165 = arith.mulf %161, %160 : vector<8x128xf32>
    %166 = arith.addf %164, %165 : vector<8x128xf32>
    %167 = math.tanh %166 : vector<8x128xf32>
    %168 = arith.mulf %163, %167 : vector<8x128xf32>
    %169 = arith.truncf %168 : vector<8x128xf32> to vector<8x128xbf16>
    %c7_i32 = arith.constant 7 : i32
    %c8_i32_39 = arith.constant 8 : i32
    %170 = arith.muli %c7_i32, %c8_i32_39 : i32
    %171 = tpu.assume_multiple %170, 8 : i32
    %172 = arith.index_cast %171 : i32 to index
    %c0_40 = arith.constant 0 : index
    %173 = vector.load %arg9[%172, %c0_40] : memref<64x512xf32, #tpu.memory_space<vmem>>, vector<8x512xf32>
    %cst_41 = arith.constant dense<0.000000e+00> : vector<8x512xf32>
    %174 = tpu.matmul %169, %8, %cst_41 {dimension_numbers = #tpu.dot_dimension_numbers<[1], [0], [0], [1], [0, 0, 1, 1], [], []>} : vector<8x128xbf16>, vector<128x512xbf16>, vector<8x512xf32> -> vector<8x512xf32>
    %175 = arith.addf %173, %174 : vector<8x512xf32>
    %176 = vector.extract_strided_slice %175 {offsets = [0, 0], sizes = [8, 384], strides = [1, 1]} : vector<8x512xf32> to vector<8x384xf32>
    %177 = arith.negf %176 : vector<8x384xf32>
    %178 = math.exp %177 : vector<8x384xf32>
    %cst_42 = arith.constant 1.000000e+00 : f32
    %179 = vector.broadcast %cst_42 : f32 to vector<8x384xf32>
    %180 = arith.addf %179, %178 : vector<8x384xf32>
    %181 = arith.divf %179, %180 : vector<8x384xf32>
    %182 = vector.extract_strided_slice %175 {offsets = [0, 384], sizes = [8, 128], strides = [1, 1]} : vector<8x512xf32> to vector<8x128xf32>
    %183 = math.tanh %182 : vector<8x128xf32>
    %184 = vector.extract_strided_slice %181 {offsets = [0, 0], sizes = [8, 128], strides = [1, 1]} : vector<8x384xf32> to vector<8x128xf32>
    %185 = vector.extract_strided_slice %181 {offsets = [0, 128], sizes = [8, 128], strides = [1, 1]} : vector<8x384xf32> to vector<8x128xf32>
    %186 = vector.extract_strided_slice %181 {offsets = [0, 256], sizes = [8, 128], strides = [1, 1]} : vector<8x384xf32> to vector<8x128xf32>
    %187 = arith.mulf %185, %166 : vector<8x128xf32>
    %188 = arith.mulf %184, %183 : vector<8x128xf32>
    %189 = arith.addf %187, %188 : vector<8x128xf32>
    %190 = math.tanh %189 : vector<8x128xf32>
    %191 = arith.mulf %186, %190 : vector<8x128xf32>
    %192 = arith.truncf %191 : vector<8x128xf32> to vector<8x128xbf16>
    %c7_i32_43 = arith.constant 7 : i32
    %193 = vector.extract_strided_slice %192 {offsets = [0, 0], sizes = [8, 64], strides = [1, 1]} : vector<8x128xbf16> to vector<8x64xbf16>
    %c0_44 = arith.constant 0 : index
    %c0_45 = arith.constant 0 : index
    %194 = vector.load %arg5[%c0_44, %c0_45] : memref<64x4xbf16, #tpu.memory_space<vmem>>, vector<64x4xbf16>
    %cst_46 = arith.constant dense<0.000000e+00> : vector<8x4xf32>
    %195 = tpu.matmul %193, %194, %cst_46 {dimension_numbers = #tpu.dot_dimension_numbers<[1], [0], [0], [1], [0, 0, 1, 1], [], []>} : vector<8x64xbf16>, vector<64x4xbf16>, vector<8x4xf32> -> vector<8x4xf32>
    %c0_47 = arith.constant 0 : index
    %c0_48 = arith.constant 0 : index
    %196 = vector.load %arg6[%c0_47, %c0_48] : memref<64x4xbf16, #tpu.memory_space<vmem>>, vector<64x4xbf16>
    %cst_49 = arith.constant dense<0.000000e+00> : vector<8x4xf32>
    %197 = tpu.matmul %31, %196, %cst_49 {dimension_numbers = #tpu.dot_dimension_numbers<[1], [0], [0], [1], [0, 0, 1, 1], [], []>} : vector<8x64xbf16>, vector<64x4xbf16>, vector<8x4xf32> -> vector<8x4xf32>
    %198 = arith.addf %195, %197 : vector<8x4xf32>
    %c0_50 = arith.constant 0 : index
    %c0_51 = arith.constant 0 : index
    %199 = vector.load %arg7[%c0_50, %c0_51] : memref<1x4xf32, #tpu.memory_space<vmem>>, vector<1x4xf32>
    %200 = vector.broadcast %199 : vector<1x4xf32> to vector<8x4xf32>
    %201 = arith.addf %198, %200 : vector<8x4xf32>
    %c0_52 = arith.constant 0 : index
    %c0_53 = arith.constant 0 : index
    %c0_54 = arith.constant 0 : index
    %202 = vector.load %arg8[%c0_52, %c0_53, %c0_54] : memref<1x8x4xf32, #tpu.memory_space<vmem>>, vector<1x8x4xf32>
    %203 = vector.shape_cast %202 : vector<1x8x4xf32> to vector<8x4xf32>
    %204 = vector.shape_cast %201 : vector<8x4xf32> to vector<1x8x4xf32>
    tpu.vector_store %arg8[%c0_52, %c0_53, %c0_54], %204 {strides = array<i32>} : memref<1x8x4xf32, #tpu.memory_space<vmem>>, vector<1x8x4xf32>,
    return
  }
  func.func @transform_0(%arg0: i32) -> (i32, i32, i32) {
    %c0_i32 = arith.constant 0 : i32
    %c0_i32_0 = arith.constant 0 : i32
    %c0_i32_1 = arith.constant 0 : i32
    return %arg0, %c0_i32, %c0_i32_0 : i32, i32, i32
  }
  func.func @transform_1(%arg0: i32) -> (i32, i32) {
    %c0_i32 = arith.constant 0 : i32
    %c0_i32_0 = arith.constant 0 : i32
    %c0_i32_1 = arith.constant 0 : i32
    return %c0_i32, %c0_i32_0 : i32, i32
  }
  func.func @transform_2(%arg0: i32) -> (i32, i32) {
    %c0_i32 = arith.constant 0 : i32
    %c0_i32_0 = arith.constant 0 : i32
    %c0_i32_1 = arith.constant 0 : i32
    return %c0_i32, %c0_i32_0 : i32, i32
  }
  func.func @transform_3(%arg0: i32) -> (i32, i32) {
    %c0_i32 = arith.constant 0 : i32
    %c0_i32_0 = arith.constant 0 : i32
    %c0_i32_1 = arith.constant 0 : i32
    return %c0_i32, %c0_i32_0 : i32, i32
  }
  func.func @transform_4(%arg0: i32) -> (i32, i32) {
    %c0_i32 = arith.constant 0 : i32
    %c0_i32_0 = arith.constant 0 : i32
    %c0_i32_1 = arith.constant 0 : i32
    return %c0_i32, %c0_i32_0 : i32, i32
  }
  func.func @transform_5(%arg0: i32) -> (i32, i32) {
    %c0_i32 = arith.constant 0 : i32
    %c0_i32_0 = arith.constant 0 : i32
    %c0_i32_1 = arith.constant 0 : i32
    return %c0_i32, %c0_i32_0 : i32, i32
  }
  func.func @transform_6(%arg0: i32) -> (i32, i32) {
    %c0_i32 = arith.constant 0 : i32
    %c0_i32_0 = arith.constant 0 : i32
    %c0_i32_1 = arith.constant 0 : i32
    return %c0_i32, %c0_i32_0 : i32, i32
  }
  func.func @transform_7(%arg0: i32) -> (i32, i32, i32) {
    %c0_i32 = arith.constant 0 : i32
    %c0_i32_0 = arith.constant 0 : i32
    %c0_i32_1 = arith.constant 0 : i32
    return %arg0, %c0_i32, %c0_i32_0 : i32, i32, i32
  }
}

</mosaic_0001>

<bundles_post_ra>
// kernel: tpu_custom_call.1
= control target key start
LH: loop header
LB: loop body
LE: loop exit
PB: predicated region body
PF: predicated region fallthrough
CT: control target
= control target key end

     0   :  { %12 = vsyncpa [#allocation4], 0  ;;  %s2429_s24 = smov 0   ;;  %s3111_s0 = inlined_call_operand.vmem [shape: bf16[2,64,32], index: 0, kind: input, shape index: {}]   ;;  %s3112_s1 = inlined_call_operand.vmem [shape: bf16[32,512], index: 1, kind: input, shape index: {}]   ;;  %s3113_s2 = inlined_call_operand.vmem [shape: f32[1,512], index: 2, kind: input, shape index: {}]   ;;  %s3114_s3 = inlined_call_operand.hbm [shape: bf16[128,512], index: 3, kind: input, shape index: {}]   ;;  %s3115_s4 = inlined_call_operand.vmem [shape: bf16[64,4], index: 4, kind: input, shape index: {}]   ;;  %s3116_s5 = inlined_call_operand.vmem [shape: bf16[64,4], index: 5, kind: input, shape index: {}]   ;;  %s3117_s6 = inlined_call_operand.vmem [shape: f32[1,4], index: 6, kind: input, shape index: {}]   ;;  %s3118_s7 = inlined_call_operand.vmem [shape: f32[2,8,4], index: 7, kind: output, shape index: {}]  }
   0x1 LB: > { %s2435_s25 = sadd.s32 4294967295, %s2380_s24   ;;  %p1953_p0 = scmp.ge.s32.totalorder %s2380_s24, 1  ;;  %s2380_s24 = sphi %s2429_s24, %s18_s24  }
   0x2   : > { %p201_p1 = scmp.lt.s32.totalorder %s2380_s24, 3  ;;  %s2382_s26 = smov [#allocation3]  }
   0x3   : > { %s219_s27 = sshll.u32 %s2382_s26, 4  ;;  %p3119_p3 = scmp.eq.s32.totalorder %s2435_s25, 0  ;;  %s220_s27 = int_to_ptr.vmem [resolvable:$true] %s219_s27 }
   0x4   : > { %p2439_p2 = pnand %p1953_p0, %p201_p1  ;;  %s2342_s9 = scalar_lea.hbm %s3114_s3, 4096 }
   0x5   : > { %p2343_p6 = scmp.ne.s32.totalorder %s3114_s3, %s2342_s9  ;;  %p2349_p10 = scmp.lt.u32.totalorder %s2342_s9, %s3114_s3 }
   0x6   : > { %s3123_s28 = scalar_select %p2439_p2, 1, 0 }
   0x7   : > { %p2089_p4 = pneg %p2439_p2 }
   0x9   : > { %p2448_p5 = pnand %p3119_p3, %p2089_p4 }
   0xb   : > { %p2344_p7 = pneg %p2448_p5 }
   0xd   : > { %p2345_p8 = pnand %p2344_p7, %p2343_p6 }
   0xf   : > { %p2346_p9 = pneg %p2345_p8 }
  0x11   : > { %p2351_p11 = pnand %p2349_p10, %p2346_p9 }
  0x13   : > { %2354 = shalt.err (!%p2351_p11)
}
  0x14   : > { %s2355_s14 = scalar_lea.vmem %s220_s27, 4096  ;;  %p2363_p1 = scmp.lt.s32.totalorder %s220_s27, %s220_s27 }
  0x15   : > { %p2356_p12 = scmp.ne.s32.totalorder %s220_s27, %s2355_s14  ;;  %p2364_p4 = scmp.lt.s32.totalorder %s2355_s14, %s2355_s14 }
  0x17   : > { %p2358_p13 = pnand %p2356_p12, %p2344_p7  ;;  %p2365_p3 = por %p2364_p4, %p2363_p1 }
  0x19   : > { %p2359_p0 = pneg %p2358_p13 }
  0x1b   : > { %p2366_p2 = pnand %p2365_p3, %p2359_p0 }
  0x1d   : > { %2369 = shalt.err (!%p2366_p2)
}
  0x1e   : > { %s2383_s15 = smov 256   ;;  %s2384_s16 = smov 16  }
  0x1f   : > { %2092 = dma.hbm_to_vmem [thread:$0]  (!%p2448_p5), %s3114_s3, 4096, %s220_s27, [#allocation4], %s2383_s15, %s2383_s15, %s2384_s16  }
  0x20   : > { %p3125_p6 = scmp.ne.s32.totalorder %s3123_s28, 0 }
  0x22   : > { %252 = sbr.rel (%p3125_p6) target bundleno = 2383 (0x94f), region = 48 }
  0x29   : > { %p3126_p8 = scmp.eq.s32.totalorder %s2435_s25, 0 }
  0x2b   : > { %2375 = dma.done.wait (%p3126_p8), [#allocation4], 4096   ;;  %p3127_p7 = pmov %p3126_p8 }
  0x2c   : > { %p283_p2 = scmp.lt.s32.totalorder %s2435_s25, 1  ;;  %v3121_v0 = vmov 0   ;;  %v2110_v1 = vld [vmem:[%s3112_s1 + $0x4] ss:$16 sps:$4 sm:$0xff]   ;;  %v2112_v2 = vld [vmem:[%s3112_s1 + $0xc] ss:$16 sps:$4 sm:$0xff]   ;;  %v311_v45 = vlaneseq }
  0x2d   : > { %2377 = vsyncadd (%p3127_p7), [#allocation4], 4294963200  ;;  %436 = vmatprep.mubr.bf16.mxu0 %v3121_v0  ;;  %509 = vmatprep.mubr.bf16.mxu1 %v3121_v0  ;;  %v2114_v3 = vld [vmem:[%s3112_s1] ss:$16 sps:$4 sm:$0xff]   ;;  %v2115_v4 = vld [vmem:[%s3112_s1 + $0x8] ss:$16 sps:$4 sm:$0xff]  }
  0x2e   : > { %s3172_s25 = smov (!%p283_p2, %s2435_s25), 1  ;;  %404 = vmatprep.subr.bf16.mxu0 %v2110_v1  ;;  %477 = vmatprep.subr.bf16.mxu1 %v2112_v2  ;;  %v2116_v5 = vld [vmem:[%s3112_s1 + $0x24] ss:$16 sps:$4 sm:$0xff]   ;;  %v2118_v6 = vld [vmem:[%s3112_s1 + $0x2c] ss:$16 sps:$4 sm:$0xff]   ;;  %vm391_vm0 = vcmask 261120  }
  0x2f   : > { %s2050_s21 = sshll.u32 %s3172_s25, 5  ;;  %405 = vmatpush1.bf16.msra.mxu0 %v2114_v3  ;;  %478 = vmatpush1.bf16.msra.mxu1 %v2115_v4  ;;  %v2120_v7 = vld [vmem:[%s3112_s1 + $0x20] ss:$16 sps:$4 sm:$0xff]   ;;  %v2121_v8 = vld [vmem:[%s3112_s1 + $0x28] ss:$16 sps:$4 sm:$0xff]   ;;  %v312_v46 = vshrl.u32 %v311_v45, 7 }
  0x30   : > { %s2499_s11 = scalar_lea.vmem %s3111_s0, %s2050_s21  ;;  %406 = vmatprep.subr.bf16.mxu0 %v2116_v5  ;;  %479 = vmatprep.subr.bf16.mxu1 %v2118_v6  ;;  %v2511_v10 = vld [vmem:[#allocation3 + $0x4] ss:$16 sps:$4 sm:$0xff]   ;;  %v2513_v11 = vld [vmem:[#allocation3 + $0xc] ss:$16 sps:$4 sm:$0xff]   ;;  %v2515_v12 = vld [vmem:[#allocation3] ss:$16 sps:$4 sm:$0xff]  }
  0x31   : > { %v2122_v9 = vld [vmem:[%s2499_s11] sm:$0xff]   ;;  %v2517_v13 = vld [vmem:[#allocation3 + $0x8] ss:$16 sps:$4 sm:$0xff]   ;;  %v2523_v15 = vld [vmem:[#allocation3 + $0x2c] ss:$16 sps:$4 sm:$0xff]   ;;  %v321_v47 = vsub.s32 2, %v312_v46 }
  0x32   : > { %v2520_v14 = vld [vmem:[#allocation3 + $0x24] ss:$16 sps:$4 sm:$0xff]   ;;  %v2527_v16 = vld [vmem:[#allocation3 + $0x20] ss:$16 sps:$4 sm:$0xff]   ;;  %v2531_v17 = vld [vmem:[#allocation3 + $0x28] ss:$16 sps:$4 sm:$0xff]  }
  0x33   : > { %407 = vmatpush1.bf16.msra.mxu0 %v2120_v7  ;;  %480 = vmatpush1.bf16.msra.mxu1 %v2121_v8  ;;  %v2535_v18 = vld [vmem:[#allocation3 + $0x44] ss:$16 sps:$4 sm:$0xff]   ;;  %v2135_v19 = vld [vmem:[%s2499_s11 + $0x8] sm:$0xff]   ;;  %v2542_v21 = vld [vmem:[#allocation3 + $0x40] ss:$16 sps:$4 sm:$0xff]   ;;  %v325_v48 = vsub.s32 3, %v312_v46 }
  0x34   : > { %778 = vmatprep.subr.bf16.mxu0 %v2511_v10  ;;  %819 = vmatprep.subr.bf16.mxu1 %v2513_v11  ;;  %v2540_v20 = vld [vmem:[#allocation3 + $0x4c] ss:$16 sps:$4 sm:$0xff]   ;;  %v2546_v22 = vld [vmem:[#allocation3 + $0x48] ss:$16 sps:$4 sm:$0xff]   ;;  %v2550_v23 = vld [vmem:[#allocation3 + $0x64] ss:$16 sps:$4 sm:$0xff]  }
  0x35   : > { %v2552_v24 = vld [vmem:[#allocation3 + $0x6c] ss:$16 sps:$4 sm:$0xff]   ;;  %v2556_v25 = vld [vmem:[#allocation3 + $0x60] ss:$16 sps:$4 sm:$0xff]   ;;  %v2560_v26 = vld [vmem:[#allocation3 + $0x68] ss:$16 sps:$4 sm:$0xff]  }
  0x36   : > { %1973 = vmatmul.mubr.msk.bf16.vlgmr.msra.gmra.mrb[0].mxu0 %vm391_vm0, %v2122_v9  ;;  %1977 = vmatmul.mubr.msk.bf16.vlgmr.msra.gmra.mrb[0].mxu1 %vm391_vm0, %v2122_v9  ;;  %v2564_v27 = vld [vmem:[#allocation3 + $0x84] ss:$16 sps:$4 sm:$0xff]   ;;  %v2566_v28 = vld [vmem:[#allocation3 + $0x8c] ss:$16 sps:$4 sm:$0xff]   ;;  %v2571_v30 = vld [vmem:[#allocation3 + $0x80] ss:$16 sps:$4 sm:$0xff]  }
  0x37   : > { %779 = vmatpush1.bf16.msra.mxu0 %v2515_v12  ;;  %820 = vmatpush1.bf16.msra.mxu1 %v2517_v13  ;;  %v2148_v29 = vld [vmem:[%s2499_s11 + $0x10] sm:$0xff]   ;;  %v2573_v31 = vld [vmem:[#allocation3 + $0x88] ss:$16 sps:$4 sm:$0xff]   ;;  %v2581_v33 = vld [vmem:[#allocation3 + $0xac] ss:$16 sps:$4 sm:$0xff]   ;;  %v313_v49 = vsub.s32 0, %v312_v46 }
  0x38   : > { %780 = vmatprep.subr.bf16.mxu0 %v2520_v14  ;;  %821 = vmatprep.subr.bf16.mxu1 %v2523_v15  ;;  %v2577_v32 = vld [vmem:[#allocation3 + $0xa4] ss:$16 sps:$4 sm:$0xff]   ;;  %v2585_v34 = vld [vmem:[#allocation3 + $0xa0] ss:$16 sps:$4 sm:$0xff]   ;;  %v2587_v35 = vld [vmem:[#allocation3 + $0xa8] ss:$16 sps:$4 sm:$0xff]  }
  0x39   : > { %446 = vmatprep.mubr.bf16.mxu0 %v3121_v0  ;;  %519 = vmatprep.mubr.bf16.mxu1 %v3121_v0  ;;  %v2591_v36 = vld [vmem:[#allocation3 + $0xc4] ss:$16 sps:$4 sm:$0xff]   ;;  %v2595_v37 = vld [vmem:[#allocation3 + $0xcc] ss:$16 sps:$4 sm:$0xff]   ;;  %v2600_v39 = vld [vmem:[#allocation3 + $0xc0] ss:$16 sps:$4 sm:$0xff]  }
  0x3a   : > { %v2161_v38 = vld [vmem:[%s2499_s11 + $0x18] sm:$0xff]   ;;  %v2604_v41 = vld [vmem:[#allocation3 + $0xe4] ss:$16 sps:$4 sm:$0xff]   ;;  %v2616_v43 = vld [vmem:[#allocation3 + $0xe0] ss:$16 sps:$4 sm:$0xff]   ;;  %v317_v51 = vsub.s32 1, %v312_v46 }
  0x3b   : > { %781 = vmatpush1.bf16.msra.mxu0 %v2527_v16  ;;  %822 = vmatpush1.bf16.msra.mxu1 %v2531_v17  ;;  %v2602_v40 = vld [vmem:[#allocation3 + $0xc8] ss:$16 sps:$4 sm:$0xff]   ;;  %v2606_v42 = vld [vmem:[#allocation3 + $0xec] ss:$16 sps:$4 sm:$0xff]   ;;  %v309_v50 = vld [vmem:[%s3113_s2] sm:$0xf] }
  0x3c   : > { %782 = vmatprep.subr.bf16.mxu0 %v2535_v18  ;;  %823 = vmatprep.subr.bf16.mxu1 %v2540_v20  ;;  %v2618_v44 = vld [vmem:[#allocation3 + $0xe8] ss:$16 sps:$4 sm:$0xff]   ;;  %v2667_v52 = vrot.slane %v309_v50, %v321_v47  ;;  %v2673_v55 = vrot.slane %v309_v50, %v325_v48  ;;  %v314_v56 = vrot.slane %v309_v50, %v313_v49  ;;  %s2386_s20 = smov 64   ;;  %vm2388_vm1 = vmmov 0   ;;  %s1960_s16 = sshll.u32 %s3172_s25, 3 }
  0x3d   : > { %v318_v59 = vrot.slane %v309_v50, %v317_v51  ;;  %vm1758_vm2 = vcmask 523264   ;;  %s291_s21 = scalar_lea.vmem %s3118_s7, %s1960_s16  ;;  %vm1877_vm3 = vcmask 31744  }
  0x3e   : > { %1974 = vmatmul.mubr.msk.bf16.gmra.mrb[4].mxu0 %vm391_vm0, %v2135_v19  ;;  %1978 = vmatmul.mubr.msk.bf16.gmra.mrb[4].mxu1 %vm391_vm0, %v2135_v19 }
  0x3f   : > { %783 = vmatpush1.bf16.msra.mxu0 %v2542_v21  ;;  %824 = vmatpush1.bf16.msra.mxu1 %v2546_v22 }
  0x40   : > { %784 = vmatprep.subr.bf16.mxu0 %v2550_v23  ;;  %825 = vmatprep.subr.bf16.mxu1 %v2552_v24 }
  0x41   : > { %456 = vmatprep.mubr.bf16.mxu0 %v3121_v0  ;;  %529 = vmatprep.mubr.bf16.mxu1 %v3121_v0 }
  0x43   : > { %785 = vmatpush1.bf16.msra.mxu0 %v2556_v25  ;;  %826 = vmatpush1.bf16.msra.mxu1 %v2560_v26 }
  0x44   : > { %786 = vmatprep.subr.bf16.mxu0 %v2564_v27  ;;  %827 = vmatprep.subr.bf16.mxu1 %v2566_v28 }
  0x46   : > { %1975 = vmatmul.mubr.msk.bf16.gmra.mrb[8].mxu0 %vm391_vm0, %v2148_v29  ;;  %1979 = vmatmul.mubr.msk.bf16.gmra.mrb[8].mxu1 %vm391_vm0, %v2148_v29 }
  0x47   : > { %787 = vmatpush1.bf16.msra.mxu0 %v2571_v30  ;;  %828 = vmatpush1.bf16.msra.mxu1 %v2573_v31 }
  0x48   : > { %788 = vmatprep.subr.bf16.mxu0 %v2577_v32  ;;  %829 = vmatprep.subr.bf16.mxu1 %v2581_v33 }
  0x49   : > { %466 = vmatprep.mubr.bf16.mxu0 %v3121_v0  ;;  %539 = vmatprep.mubr.bf16.mxu1 %v3121_v0 }
  0x4b   : > { %789 = vmatpush1.bf16.msra.mxu0 %v2585_v34  ;;  %830 = vmatpush1.bf16.msra.mxu1 %v2587_v35 }
  0x4c   : > { %790 = vmatprep.subr.bf16.mxu0 %v2591_v36  ;;  %831 = vmatprep.subr.bf16.mxu1 %v2595_v37 }
  0x4e   : > { %1976 = vmatmul.mubr.msk.bf16.gmra.mrb[12].mxu0 %vm391_vm0, %v2161_v38  ;;  %1980 = vmatmul.mubr.msk.bf16.gmra.mrb[12].mxu1 %vm391_vm0, %v2161_v38 }
  0x4f   : > { %791 = vmatpush1.bf16.msra.mxu0 %v2600_v39  ;;  %832 = vmatpush1.bf16.msra.mxu1 %v2602_v40 }
  0x50   : > { %792 = vmatprep.subr.bf16.mxu0 %v2604_v41  ;;  %833 = vmatprep.subr.bf16.mxu1 %v2606_v42 }
  0x51   : > { %810 = vmatprep.mubr.bf16.mxu0 %v3121_v0  ;;  %851 = vmatprep.mubr.bf16.mxu1 %v3121_v0 }
  0x53   : > { %793 = vmatpush1.bf16.msra.mxu0 %v2616_v43  ;;  %834 = vmatpush1.bf16.msra.mxu1 %v2618_v44 }
  0x54   : > { %896 = vmatprep.subr.bf16.mxu0 %v2511_v10  ;;  %937 = vmatprep.subr.bf16.mxu1 %v2513_v11 }
  0x56   : > { %811 = vmatmul.mubr.bf16.vlgmr.msra.gmra.mrb[16].mxu0 %v3121_v0  ;;  %852 = vmatmul.mubr.bf16.vlgmr.msra.gmra.mrb[16].mxu1 %v3121_v0 }
  0x57   : > { %897 = vmatpush1.bf16.msra.mxu0 %v2515_v12  ;;  %938 = vmatpush1.bf16.msra.mxu1 %v2517_v13 }
  0x58   : > { %898 = vmatprep.subr.bf16.mxu0 %v2520_v14  ;;  %939 = vmatprep.subr.bf16.mxu1 %v2523_v15 }
  0x59   : > { %928 = vmatprep.mubr.bf16.mxu0 %v3121_v0  ;;  %969 = vmatprep.mubr.bf16.mxu1 %v3121_v0 }
  0x5b   : > { %899 = vmatpush1.bf16.msra.mxu0 %v2527_v16  ;;  %940 = vmatpush1.bf16.msra.mxu1 %v2531_v17 }
  0x5c   : > { %900 = vmatprep.subr.bf16.mxu0 %v2535_v18  ;;  %941 = vmatprep.subr.bf16.mxu1 %v2540_v20 }
  0x5f   : > { %901 = vmatpush1.bf16.msra.mxu0 %v2542_v21  ;;  %942 = vmatpush1.bf16.msra.mxu1 %v2546_v22 }
  0x60   : > { %902 = vmatprep.subr.bf16.mxu0 %v2550_v23  ;;  %943 = vmatprep.subr.bf16.mxu1 %v2552_v24 }
  0x63   : > { %903 = vmatpush1.bf16.msra.mxu0 %v2556_v25  ;;  %944 = vmatpush1.bf16.msra.mxu1 %v2560_v26 }
  0x64   : > { %904 = vmatprep.subr.bf16.mxu0 %v2564_v27  ;;  %945 = vmatprep.subr.bf16.mxu1 %v2566_v28 }
  0x67   : > { %905 = vmatpush1.bf16.msra.mxu0 %v2571_v30  ;;  %946 = vmatpush1.bf16.msra.mxu1 %v2573_v31 }
  0x68   : > { %906 = vmatprep.subr.bf16.mxu0 %v2577_v32  ;;  %947 = vmatprep.subr.bf16.mxu1 %v2581_v33 }
  0x6b   : > { %907 = vmatpush1.bf16.msra.mxu0 %v2585_v34  ;;  %948 = vmatpush1.bf16.msra.mxu1 %v2587_v35 }
  0x6c   : > { %908 = vmatprep.subr.bf16.mxu0 %v2591_v36  ;;  %949 = vmatprep.subr.bf16.mxu1 %v2595_v37 }
  0x6f   : > { %909 = vmatpush1.bf16.msra.mxu0 %v2600_v39  ;;  %950 = vmatpush1.bf16.msra.mxu1 %v2602_v40 }
  0x70   : > { %910 = vmatprep.subr.bf16.mxu0 %v2604_v41  ;;  %951 = vmatprep.subr.bf16.mxu1 %v2606_v42 }
  0x73   : > { %911 = vmatpush1.bf16.msra.mxu0 %v2616_v43  ;;  %952 = vmatpush1.bf16.msra.mxu1 %v2618_v44 }
  0x74   : > { %1014 = vmatprep.subr.bf16.mxu0 %v2511_v10  ;;  %1055 = vmatprep.subr.bf16.mxu1 %v2513_v11 }
 0x109   : > { %v2669_v53 = vpop.f32.mrb[0].mxu0  ;;  %v2671_v54 = vpop.f32.mrb[0].mxu1 }
 0x10a   : > { %v440_v57 = vpop.f32.mrb[1].mxu0  ;;  %v513_v58 = vpop.f32.mrb[1].mxu1 }
 0x10b   : > { %v442_v60 = vpop.f32.mrb[2].mxu0  ;;  %v515_v61 = vpop.f32.mrb[2].mxu1 }
 0x10c   : > { %v2675_v62 = vadd.f32 %v442_v60, %v314_v56  ;;  %v444_v63 = vpop.f32.mrb[3].mxu0  ;;  %v2678_v1 = vadd.f32 %v515_v61, %v2667_v52  ;;  %v517_v2 = vpop.f32.mrb[3].mxu1 }
 0x10d   : > { %v2680_v3 = vadd.f32 %v444_v63, %v318_v59  ;;  %v2683_v4 = vadd.f32 %v517_v2, %v2673_v55 }
 0x111   : > { %v448_v5 = vpop.f32.mrb[4].mxu0  ;;  %v521_v6 = vpop.f32.mrb[4].mxu1 }
 0x112   : > { %v2685_v7 = vadd.f32 %v448_v5, %v314_v56  ;;  %v450_v8 = vpop.f32.mrb[5].mxu0  ;;  %v2688_v9 = vadd.f32 %v521_v6, %v2667_v52  ;;  %v523_v19 = vpop.f32.mrb[5].mxu1 }
 0x113   : > { %v2690_v29 = vadd.f32 %v450_v8, %v318_v59  ;;  %v452_v38 = vpop.f32.mrb[6].mxu0  ;;  %v2693_v45 = vadd.f32 %v523_v19, %v2673_v55  ;;  %v525_v46 = vpop.f32.mrb[6].mxu1 }
 0x114   : > { %v2695_v47 = vadd.f32 %v452_v38, %v314_v56  ;;  %v454_v48 = vpop.f32.mrb[7].mxu0  ;;  %v2698_v49 = vadd.f32 %v525_v46, %v2667_v52  ;;  %v527_v50 = vpop.f32.mrb[7].mxu1 }
 0x115   : > { %3128 = vst [vmem:[#allocation6_spill] sm:$0xff] %v2693_v45  ;;  %v2700_v51 = vadd.f32 %v454_v48, %v318_v59  ;;  %v2703_v60 = vadd.f32 %v527_v50, %v2673_v55 }
 0x116   : > { %3129 = vst [vmem:[#allocation7_spill] sm:$0xff] %v2695_v47  ;;  %3130 = vst [vmem:[#allocation8_spill] sm:$0xff] %v2698_v49 }
 0x117   : > { %3131 = vst [vmem:[#allocation9_spill] sm:$0xff] %v2700_v51  ;;  %3132 = vst [vmem:[#allocation10_spill] sm:$0xff] %v2703_v60 }
 0x119   : > { %v458_v61 = vpop.f32.mrb[8].mxu0  ;;  %v531_v63 = vpop.f32.mrb[8].mxu1 }
 0x11a   : > { %v2705_v2 = vadd.f32 %v458_v61, %v314_v56  ;;  %v460_v5 = vpop.f32.mrb[9].mxu0  ;;  %v2708_v6 = vadd.f32 %v531_v63, %v2667_v52  ;;  %v533_v8 = vpop.f32.mrb[9].mxu1 }
 0x11b   : > { %v2710_v19 = vadd.f32 %v460_v5, %v318_v59  ;;  %v462_v38 = vpop.f32.mrb[10].mxu0  ;;  %v2713_v46 = vadd.f32 %v533_v8, %v2673_v55  ;;  %v535_v48 = vpop.f32.mrb[10].mxu1 }
 0x11c   : > { %3133 = vst [vmem:[#allocation11_spill] sm:$0xff] %v2705_v2  ;;  %3134 = vst [vmem:[#allocation12_spill] sm:$0xff] %v2708_v6  ;;  %v2715_v0 = vadd.f32 %v462_v38, %v314_v56  ;;  %v464_v50 = vpop.f32.mrb[11].mxu0  ;;  %v2718_v60 = vadd.f32 %v535_v48, %v2667_v52  ;;  %v537_v61 = vpop.f32.mrb[11].mxu1 }
 0x11d   : > { %3135 = vst [vmem:[#allocation13_spill] sm:$0xff] %v2710_v19  ;;  %3136 = vst [vmem:[#allocation14_spill] sm:$0xff] %v2713_v46  ;;  %v2720_v2 = vadd.f32 %v464_v50, %v318_v59  ;;  %v2723_v63 = vadd.f32 %v537_v61, %v2673_v55 }
 0x11e   : > { %3137 = vst [vmem:[#allocation15_spill] sm:$0xff] %v2715_v0  ;;  %3138 = vst [vmem:[#allocation16_spill] sm:$0xff] %v2718_v60 }
 0x11f   : > { %3139 = vst [vmem:[#allocation17_spill] sm:$0xff] %v2720_v2  ;;  %3140 = vst [vmem:[#allocation18_spill] sm:$0xff] %v2723_v63 }
 0x121   : > { %v468_v6 = vpop.f32.mrb[12].mxu0  ;;  %v541_v5 = vpop.f32.mrb[12].mxu1 }
 0x122   : > { %v2725_v19 = vadd.f32 %v468_v6, %v314_v56  ;;  %v470_v51 = vpop.f32.mrb[13].mxu0  ;;  %v2728_v8 = vadd.f32 %v541_v5, %v2667_v52  ;;  %v543_v38 = vpop.f32.mrb[13].mxu1 }
 0x123   : > { %v2730_v0 = vadd.f32 %v470_v51, %v318_v59  ;;  %v472_v46 = vpop.f32.mrb[14].mxu0  ;;  %v2733_v48 = vadd.f32 %v543_v38, %v2673_v55  ;;  %v545_v50 = vpop.f32.mrb[14].mxu1  ;;  %v439_v51 = vadd.f32 %v2669_v53, %v314_v56  ;;  %v441_v38 = vadd.f32 %v440_v57, %v318_v59 }
 0x124   : > { %3141 = vst [vmem:[#allocation19_spill] sm:$0xff] %v2725_v19  ;;  %3142 = vst [vmem:[#allocation20_spill] sm:$0xff] %v2728_v8  ;;  %v2735_v2 = vadd.f32 %v472_v46, %v314_v56  ;;  %v474_v61 = vpop.f32.mrb[15].mxu0  ;;  %v2738_v63 = vadd.f32 %v545_v50, %v2667_v52  ;;  %v547_v6 = vpop.f32.mrb[15].mxu1 }
 0x125   : > { %3143 = vst [vmem:[#allocation21_spill] sm:$0xff] %v2730_v0  ;;  %3144 = vst [vmem:[#allocation22_spill] sm:$0xff] %v2733_v48  ;;  %v2740_v19 = vadd.f32 %v474_v61, %v318_v59  ;;  %v2743_v5 = vadd.f32 %v547_v6, %v2673_v55  ;;  %v512_v0 = vadd.f32 %v2671_v54, %v2667_v52 }
 0x126   : > { %3145 = vst [vmem:[#allocation23_spill] sm:$0xff] %v2735_v2  ;;  %3146 = vst [vmem:[#allocation24_spill] sm:$0xff] %v2738_v63  ;;  %v514_v48 = vadd.f32 %v513_v58, %v2673_v55 }
 0x127   : > { %3147 = vst [vmem:[#allocation25_spill] sm:$0xff] %v2740_v19  ;;  %3148 = vst [vmem:[#allocation26_spill] sm:$0xff] %v2743_v5 }
 0x129   : > { %v812_v46 = vpop.f32.mrb[16].mxu0  ;;  %v853_v2 = vpop.f32.mrb[16].mxu1 }
 0x12a   : > { %v860_v8 = vadd.f32 %v812_v46, %v439_v51  ;;  %v862_v60 = vadd.f32 %v853_v2, %v512_v0  ;;  %v814_v50 = vpop.f32.mrb[17].mxu0  ;;  %v855_v63 = vpop.f32.mrb[17].mxu1 }
 0x12b   : > { %v861_v49 = vadd.f32 %v814_v50, %v441_v38  ;;  %v863_v61 = vadd.f32 %v855_v63, %v514_v48  ;;  %v816_v19 = vpop.f32.mrb[18].mxu0  ;;  %v857_v47 = vpop.f32.mrb[18].mxu1 }
 0x12c   : > { %v2013_v6 = vmul.f32 -1.442695, %v860_v8  ;;  %v817_v5 = vpop.f32.mrb[19].mxu0  ;;  %v858_v45 = vpop.f32.mrb[19].mxu1  ;;  %v2015_v52 = vmul.f32 -1.442695, %v862_v60 }
 0x12d   : > { %v2014_v53 = vmul.f32 -1.442695, %v861_v49  ;;  %v3149_v5 = vmov 0  }
 0x12e   : > { %2182 = vpow2.f32 %v2013_v6 }
 0x12f   : > { %2184 = vpow2.f32 %v2014_v53 }
 0x130   : > { %2186 = vtanh.f32 %v863_v61 }
 0x131   : > { %2188 = vpow2.f32 %v2015_v52 }
 0x138   : > { %v2183_v54 = vpop.eup %2182 }
 0x139   : > { %v873_v56 = vadd.f32 1.0, %v2183_v54  ;;  %v2185_v55 = vpop.eup %2184 }
 0x13a   : > { %v874_v0 = vadd.f32 1.0, %v2185_v55  ;;  %v2187_v57 = vpop.eup %2186 }
 0x13b   : > { %2190 = vrcp.f32 %v873_v56  ;;  %v2189_v58 = vpop.eup %2188 }
 0x13c   : > { %2192 = vrcp.f32 %v874_v0  ;;  %v875_v19 = vadd.f32 1.0, %v2189_v58 }
 0x13e   : > { %2194 = vrcp.f32 %v875_v19 }
 0x145   : > { %v2191_v59 = vpop.eup %2190 }
 0x146   : > { %v884_v2 = vmul.f32 %v2191_v59, %v2187_v57  ;;  %v2193_v47 = vpop.eup %2192 }
 0x147   : > { %v883_v63 = vmul.f32 0.0, %v2193_v47 }
 0x148   : > { %v2195_v49 = vpop.eup %2194 }
 0x149   : > { %v2749_v45 = vadd.f32 %v884_v2, %v883_v63 }
 0x14b   : > { %2196 = vtanh.f32 %v2749_v45 }
 0x155   : > { %v2197_v60 = vpop.eup %2196 }
 0x156   : > { %v887_v8 = vmul.f32 %v2197_v60, %v2195_v49 }
 0x158   : > { %v888_v48 = vpack.c.bf16 %v887_v8, %v887_v8 }
 0x15a   : > { %929 = vmatmul.mubr.bf16.vlgmr.msra.gmra.mrb[20].mxu0 %v888_v48  ;;  %970 = vmatmul.mubr.bf16.vlgmr.msra.gmra.mrb[20].mxu1 %v888_v48 }
 0x15b   : > { %1732 = vrot.lane.b32.xlu0 %v888_v48, %s2386_s20  ;;  %1015 = vmatpush1.bf16.msra.mxu0 %v2515_v12 }
 0x15c   : > { %1056 = vmatpush1.bf16.msra.mxu1 %v2517_v13  ;;  %1016 = vmatprep.subr.bf16.mxu0 %v2520_v14 }
 0x15d   : > { %1057 = vmatprep.subr.bf16.mxu1 %v2523_v15  ;;  %1046 = vmatprep.mubr.bf16.mxu0 %v3149_v5 }
 0x15e   : > { %1087 = vmatprep.mubr.bf16.mxu1 %v3149_v5 }
 0x15f   : > { %1017 = vmatpush1.bf16.msra.mxu0 %v2527_v16 }
 0x160   : > { %1058 = vmatpush1.bf16.msra.mxu1 %v2531_v17  ;;  %1018 = vmatprep.subr.bf16.mxu0 %v2535_v18 }
 0x161   : > { %1059 = vmatprep.subr.bf16.mxu1 %v2540_v20 }
 0x163   : > { %1019 = vmatpush1.bf16.msra.mxu0 %v2542_v21 }
 0x164   : > { %1060 = vmatpush1.bf16.msra.mxu1 %v2546_v22  ;;  %1020 = vmatprep.subr.bf16.mxu0 %v2550_v23 }
 0x165   : > { %1061 = vmatprep.subr.bf16.mxu1 %v2552_v24 }
 0x167   : > { %1021 = vmatpush1.bf16.msra.mxu0 %v2556_v25 }
 0x168   : > { %1062 = vmatpush1.bf16.msra.mxu1 %v2560_v26  ;;  %1022 = vmatprep.subr.bf16.mxu0 %v2564_v27 }
 0x169   : > { %1063 = vmatprep.subr.bf16.mxu1 %v2566_v28 }
 0x16b   : > { %1023 = vmatpush1.bf16.msra.mxu0 %v2571_v30 }
 0x16c   : > { %1064 = vmatpush1.bf16.msra.mxu1 %v2573_v31  ;;  %1024 = vmatprep.subr.bf16.mxu0 %v2577_v32 }
 0x16d   : > { %1065 = vmatprep.subr.bf16.mxu1 %v2581_v33 }
 0x16f   : > { %1025 = vmatpush1.bf16.msra.mxu0 %v2585_v34 }
 0x170   : > { %1066 = vmatpush1.bf16.msra.mxu1 %v2587_v35  ;;  %1026 = vmatprep.subr.bf16.mxu0 %v2591_v36 }
 0x171   : > { %1067 = vmatprep.subr.bf16.mxu1 %v2595_v37 }
 0x173   : > { %1027 = vmatpush1.bf16.msra.mxu0 %v2600_v39 }
 0x174   : > { %1068 = vmatpush1.bf16.msra.mxu1 %v2602_v40  ;;  %1028 = vmatprep.subr.bf16.mxu0 %v2604_v41 }
 0x175   : > { %1069 = vmatprep.subr.bf16.mxu1 %v2606_v42 }
 0x177   : > { %1029 = vmatpush1.bf16.msra.mxu0 %v2616_v43 }
 0x178   : > { %1070 = vmatpush1.bf16.msra.mxu1 %v2618_v44  ;;  %1132 = vmatprep.subr.bf16.mxu0 %v2511_v10 }
 0x179   : > { %1173 = vmatprep.subr.bf16.mxu1 %v2513_v11 }
 0x22d   : > { %v930_v51 = vpop.f32.mrb[20].mxu0  ;;  %v971_v38 = vpop.f32.mrb[20].mxu1 }
 0x22e   : > { %v978_v46 = vadd.f32 %v930_v51, %v2675_v62  ;;  %v980_v50 = vadd.f32 %v971_v38, %v2678_v1  ;;  %v932_v61 = vpop.f32.mrb[21].mxu0  ;;  %v973_v6 = vpop.f32.mrb[21].mxu1 }
 0x22f   : > { %v979_v53 = vadd.f32 %v932_v61, %v2680_v3  ;;  %v981_v52 = vadd.f32 %v973_v6, %v2683_v4  ;;  %v934_v54 = vpop.f32.mrb[22].mxu0  ;;  %v975_v56 = vpop.f32.mrb[22].mxu1 }
 0x230   : > { %v2016_v55 = vmul.f32 -1.442695, %v978_v46  ;;  %v935_v0 = vpop.f32.mrb[23].mxu0  ;;  %v976_v57 = vpop.f32.mrb[23].mxu1  ;;  %v2018_v59 = vmul.f32 -1.442695, %v980_v50 }
 0x231   : > { %v2017_v58 = vmul.f32 -1.442695, %v979_v53 }
 0x232   : > { %2198 = vpow2.f32 %v2016_v55  ;;  %v3150_v55 = vld [vmem:[#allocation6_spill] sm:$0xff] }
 0x233   : > { %2200 = vpow2.f32 %v2017_v58 }
 0x234   : > { %2202 = vtanh.f32 %v981_v52 }
 0x235   : > { %2204 = vpow2.f32 %v2018_v59 }
 0x23c   : > { %v2199_v2 = vpop.eup %2198 }
 0x23d   : > { %v991_v47 = vadd.f32 1.0, %v2199_v2  ;;  %v2201_v62 = vpop.eup %2200 }
 0x23e   : > { %v992_v1 = vadd.f32 1.0, %v2201_v62  ;;  %v2203_v3 = vpop.eup %2202 }
 0x23f   : > { %2206 = vrcp.f32 %v991_v47  ;;  %v2205_v19 = vpop.eup %2204 }
 0x240   : > { %2208 = vrcp.f32 %v992_v1  ;;  %v993_v60 = vadd.f32 1.0, %v2205_v19 }
 0x242   : > { %2210 = vrcp.f32 %v993_v60 }
 0x249   : > { %v2207_v4 = vpop.eup %2206 }
 0x24a   : > { %v1002_v63 = vmul.f32 %v2207_v4, %v2203_v3  ;;  %v2209_v49 = vpop.eup %2208 }
 0x24b   : > { %v1001_v8 = vmul.f32 %v2209_v49, %v2749_v45 }
 0x24c   : > { %v2211_v51 = vpop.eup %2210 }
 0x24d   : > { %v2791_v48 = vadd.f32 %v1002_v63, %v1001_v8 }
 0x24f   : > { %2212 = vtanh.f32 %v2791_v48 }
 0x259   : > { %v2213_v38 = vpop.eup %2212 }
 0x25a   : > { %v1005_v46 = vmul.f32 %v2213_v38, %v2211_v51 }
 0x25c   : > { %v1006_v50 = vpack.c.bf16 %v1005_v46, %v1005_v46 }
 0x25e   : > { %1047 = vmatmul.mubr.bf16.vlgmr.msra.gmra.mrb[24].mxu0 %v1006_v50  ;;  %1088 = vmatmul.mubr.bf16.vlgmr.msra.gmra.mrb[24].mxu1 %v1006_v50 }
 0x25f   : > { %1133 = vmatpush1.bf16.msra.mxu0 %v2515_v12  ;;  %1174 = vmatpush1.bf16.msra.mxu1 %v2517_v13 }
 0x260   : > { %1134 = vmatprep.subr.bf16.mxu0 %v2520_v14  ;;  %1175 = vmatprep.subr.bf16.mxu1 %v2523_v15 }
 0x261   : > { %1164 = vmatprep.mubr.bf16.mxu0 %v3149_v5  ;;  %1205 = vmatprep.mubr.bf16.mxu1 %v3149_v5 }
 0x263   : > { %1135 = vmatpush1.bf16.msra.mxu0 %v2527_v16  ;;  %1176 = vmatpush1.bf16.msra.mxu1 %v2531_v17 }
 0x264   : > { %1136 = vmatprep.subr.bf16.mxu0 %v2535_v18  ;;  %1177 = vmatprep.subr.bf16.mxu1 %v2540_v20 }
 0x267   : > { %1137 = vmatpush1.bf16.msra.mxu0 %v2542_v21  ;;  %1178 = vmatpush1.bf16.msra.mxu1 %v2546_v22 }
 0x268   : > { %1138 = vmatprep.subr.bf16.mxu0 %v2550_v23  ;;  %1179 = vmatprep.subr.bf16.mxu1 %v2552_v24 }
 0x26b   : > { %1139 = vmatpush1.bf16.msra.mxu0 %v2556_v25  ;;  %1180 = vmatpush1.bf16.msra.mxu1 %v2560_v26 }
 0x26c   : > { %1140 = vmatprep.subr.bf16.mxu0 %v2564_v27  ;;  %1181 = vmatprep.subr.bf16.mxu1 %v2566_v28 }
 0x26f   : > { %1141 = vmatpush1.bf16.msra.mxu0 %v2571_v30  ;;  %1182 = vmatpush1.bf16.msra.mxu1 %v2573_v31 }
 0x270   : > { %1142 = vmatprep.subr.bf16.mxu0 %v2577_v32  ;;  %1183 = vmatprep.subr.bf16.mxu1 %v2581_v33 }
 0x273   : > { %1143 = vmatpush1.bf16.msra.mxu0 %v2585_v34  ;;  %1184 = vmatpush1.bf16.msra.mxu1 %v2587_v35 }
 0x274   : > { %1144 = vmatprep.subr.bf16.mxu0 %v2591_v36  ;;  %1185 = vmatprep.subr.bf16.mxu1 %v2595_v37 }
 0x277   : > { %1145 = vmatpush1.bf16.msra.mxu0 %v2600_v39  ;;  %1186 = vmatpush1.bf16.msra.mxu1 %v2602_v40 }
 0x278   : > { %1146 = vmatprep.subr.bf16.mxu0 %v2604_v41  ;;  %1187 = vmatprep.subr.bf16.mxu1 %v2606_v42 }
 0x27b   : > { %1147 = vmatpush1.bf16.msra.mxu0 %v2616_v43  ;;  %1188 = vmatpush1.bf16.msra.mxu1 %v2618_v44 }
 0x27c   : > { %1250 = vmatprep.subr.bf16.mxu0 %v2511_v10  ;;  %1291 = vmatprep.subr.bf16.mxu1 %v2513_v11 }
 0x331   : > { %v1048_v45 = vpop.f32.mrb[24].mxu0  ;;  %v1089_v61 = vpop.f32.mrb[24].mxu1 }
 0x332   : > { %v1096_v6 = vadd.f32 %v1048_v45, %v2685_v7  ;;  %v1098_v53 = vadd.f32 %v1089_v61, %v2688_v9  ;;  %v1050_v52 = vpop.f32.mrb[25].mxu0  ;;  %v1091_v54 = vpop.f32.mrb[25].mxu1 }
 0x333   : > { %v1097_v56 = vadd.f32 %v1050_v52, %v2690_v29  ;;  %v1099_v0 = vadd.f32 %v1091_v54, %v3150_v55  ;;  %v1052_v57 = vpop.f32.mrb[26].mxu0  ;;  %v1093_v58 = vpop.f32.mrb[26].mxu1  ;;  %v3153_v55 = vld [vmem:[#allocation9_spill] sm:$0xff] }
 0x334   : > { %v2019_v59 = vmul.f32 -1.442695, %v1096_v6  ;;  %v1053_v2 = vpop.f32.mrb[27].mxu0  ;;  %v1094_v47 = vpop.f32.mrb[27].mxu1  ;;  %v2021_v1 = vmul.f32 -1.442695, %v1098_v53 }
 0x335   : > { %v2020_v62 = vmul.f32 -1.442695, %v1097_v56  ;;  %v3152_v53 = vld [vmem:[#allocation8_spill] sm:$0xff]  ;;  %v3154_v57 = vld [vmem:[#allocation10_spill] sm:$0xff] }
 0x336   : > { %2214 = vpow2.f32 %v2019_v59 }
 0x337   : > { %2216 = vpow2.f32 %v2020_v62 }
 0x338   : > { %2218 = vtanh.f32 %v1099_v0 }
 0x339   : > { %2220 = vpow2.f32 %v2021_v1 }
 0x340   : > { %v2215_v3 = vpop.eup %2214 }
 0x341   : > { %v1109_v19 = vadd.f32 1.0, %v2215_v3  ;;  %v2217_v7 = vpop.eup %2216 }
 0x342   : > { %v1110_v9 = vadd.f32 1.0, %v2217_v7  ;;  %v2219_v29 = vpop.eup %2218 }
 0x343   : > { %2222 = vrcp.f32 %v1109_v19  ;;  %v2221_v4 = vpop.eup %2220 }
 0x344   : > { %2224 = vrcp.f32 %v1110_v9  ;;  %v1111_v8 = vadd.f32 1.0, %v2221_v4 }
 0x346   : > { %2226 = vrcp.f32 %v1111_v8 }
 0x34d   : > { %v2223_v63 = vpop.eup %2222 }
 0x34e   : > { %v1120_v49 = vmul.f32 %v2223_v63, %v2219_v29  ;;  %v2225_v60 = vpop.eup %2224 }
 0x34f   : > { %v1119_v51 = vmul.f32 %v2225_v60, %v2791_v48  ;;  %v3151_v48 = vld [vmem:[#allocation7_spill] sm:$0xff] }
 0x350   : > { %v2227_v46 = vpop.eup %2226 }
 0x351   : > { %v2833_v38 = vadd.f32 %v1120_v49, %v1119_v51 }
 0x353   : > { %2228 = vtanh.f32 %v2833_v38 }
 0x35d   : > { %v2229_v50 = vpop.eup %2228 }
 0x35e   : > { %v1123_v45 = vmul.f32 %v2229_v50, %v2227_v46 }
 0x360   : > { %v1124_v61 = vpack.c.bf16 %v1123_v45, %v1123_v45 }
 0x362   : > { %1165 = vmatmul.mubr.bf16.vlgmr.msra.gmra.mrb[28].mxu0 %v1124_v61  ;;  %1206 = vmatmul.mubr.bf16.vlgmr.msra.gmra.mrb[28].mxu1 %v1124_v61 }
 0x363   : > { %1251 = vmatpush1.bf16.msra.mxu0 %v2515_v12  ;;  %1292 = vmatpush1.bf16.msra.mxu1 %v2517_v13 }
 0x364   : > { %1252 = vmatprep.subr.bf16.mxu0 %v2520_v14  ;;  %1293 = vmatprep.subr.bf16.mxu1 %v2523_v15 }
 0x365   : > { %1282 = vmatprep.mubr.bf16.mxu0 %v3149_v5  ;;  %1323 = vmatprep.mubr.bf16.mxu1 %v3149_v5 }
 0x367   : > { %1253 = vmatpush1.bf16.msra.mxu0 %v2527_v16  ;;  %1294 = vmatpush1.bf16.msra.mxu1 %v2531_v17 }
 0x368   : > { %1254 = vmatprep.subr.bf16.mxu0 %v2535_v18  ;;  %1295 = vmatprep.subr.bf16.mxu1 %v2540_v20 }
 0x36b   : > { %1255 = vmatpush1.bf16.msra.mxu0 %v2542_v21  ;;  %1296 = vmatpush1.bf16.msra.mxu1 %v2546_v22 }
 0x36c   : > { %1256 = vmatprep.subr.bf16.mxu0 %v2550_v23  ;;  %1297 = vmatprep.subr.bf16.mxu1 %v2552_v24 }
 0x36f   : > { %1257 = vmatpush1.bf16.msra.mxu0 %v2556_v25  ;;  %1298 = vmatpush1.bf16.msra.mxu1 %v2560_v26 }
 0x370   : > { %1258 = vmatprep.subr.bf16.mxu0 %v2564_v27  ;;  %1299 = vmatprep.subr.bf16.mxu1 %v2566_v28 }
 0x373   : > { %1259 = vmatpush1.bf16.msra.mxu0 %v2571_v30  ;;  %1300 = vmatpush1.bf16.msra.mxu1 %v2573_v31 }
 0x374   : > { %1260 = vmatprep.subr.bf16.mxu0 %v2577_v32  ;;  %1301 = vmatprep.subr.bf16.mxu1 %v2581_v33 }
 0x377   : > { %1261 = vmatpush1.bf16.msra.mxu0 %v2585_v34  ;;  %1302 = vmatpush1.bf16.msra.mxu1 %v2587_v35 }
 0x378   : > { %1262 = vmatprep.subr.bf16.mxu0 %v2591_v36  ;;  %1303 = vmatprep.subr.bf16.mxu1 %v2595_v37 }
 0x37b   : > { %1263 = vmatpush1.bf16.msra.mxu0 %v2600_v39  ;;  %1304 = vmatpush1.bf16.msra.mxu1 %v2602_v40 }
 0x37c   : > { %1264 = vmatprep.subr.bf16.mxu0 %v2604_v41  ;;  %1305 = vmatprep.subr.bf16.mxu1 %v2606_v42 }
 0x37f   : > { %1265 = vmatpush1.bf16.msra.mxu0 %v2616_v43  ;;  %1306 = vmatpush1.bf16.msra.mxu1 %v2618_v44 }
 0x380   : > { %1368 = vmatprep.subr.bf16.mxu0 %v2511_v10  ;;  %1409 = vmatprep.subr.bf16.mxu1 %v2513_v11 }
 0x435   : > { %v1166_v12 = vpop.f32.mrb[28].mxu0  ;;  %v1207_v13 = vpop.f32.mrb[28].mxu1 }
 0x436   : > { %v1214_v6 = vadd.f32 %v1166_v12, %v3151_v48  ;;  %v1216_v52 = vadd.f32 %v1207_v13, %v3152_v53  ;;  %v1168_v54 = vpop.f32.mrb[29].mxu0  ;;  %v1209_v56 = vpop.f32.mrb[29].mxu1  ;;  %v2878_v13 = vld [vmem:[#allocation3] ss:$16 sps:$4 sm:$0xff]   ;;  %v2881_v48 = vld [vmem:[#allocation3 + $0x8] ss:$16 sps:$4 sm:$0xff]  }
 0x437   : > { %v1215_v0 = vadd.f32 %v1168_v54, %v3153_v55  ;;  %v1217_v58 = vadd.f32 %v1209_v56, %v3154_v57  ;;  %v1170_v59 = vpop.f32.mrb[30].mxu0  ;;  %v1211_v2 = vpop.f32.mrb[30].mxu1 }
 0x438   : > { %v2022_v47 = vmul.f32 -1.442695, %v1214_v6  ;;  %v1171_v62 = vpop.f32.mrb[31].mxu0  ;;  %v1212_v1 = vpop.f32.mrb[31].mxu1  ;;  %v2024_v11 = vmul.f32 -1.442695, %v1216_v52 }
 0x439   : > { %v2023_v10 = vmul.f32 -1.442695, %v1215_v0  ;;  %v2930_v2 = vld [vmem:[#allocation3 + $0x24] ss:$16 sps:$4 sm:$0xff]   ;;  %v2938_v62 = vld [vmem:[#allocation3 + $0x20] ss:$16 sps:$4 sm:$0xff]  }
 0x43a   : > { %2230 = vpow2.f32 %v2022_v47  ;;  %v2933_v47 = vld [vmem:[#allocation3 + $0x2c] ss:$16 sps:$4 sm:$0xff]   ;;  %v2941_v1 = vld [vmem:[#allocation3 + $0x28] ss:$16 sps:$4 sm:$0xff]  }
 0x43b   : > { %2232 = vpow2.f32 %v2023_v10  ;;  %v2944_v10 = vld [vmem:[#allocation3 + $0x44] ss:$16 sps:$4 sm:$0xff]  }
 0x43c   : > { %2234 = vtanh.f32 %v1217_v58 }
 0x43d   : > { %2236 = vpow2.f32 %v2024_v11  ;;  %v2947_v11 = vld [vmem:[#allocation3 + $0x4c] ss:$16 sps:$4 sm:$0xff]  }
 0x444   : > { %v2231_v3 = vpop.eup %2230 }
 0x445   : > { %v1227_v19 = vadd.f32 1.0, %v2231_v3  ;;  %v2233_v7 = vpop.eup %2232  ;;  %v2950_v3 = vld [vmem:[#allocation3 + $0x40] ss:$16 sps:$4 sm:$0xff]  }
 0x446   : > { %v1228_v9 = vadd.f32 1.0, %v2233_v7  ;;  %v2235_v29 = vpop.eup %2234  ;;  %v2956_v7 = vld [vmem:[#allocation3 + $0x64] ss:$16 sps:$4 sm:$0xff]  }
 0x447   : > { %2238 = vrcp.f32 %v1227_v19  ;;  %v2237_v4 = vpop.eup %2236  ;;  %v2953_v19 = vld [vmem:[#allocation3 + $0x48] ss:$16 sps:$4 sm:$0xff]  }
 0x448   : > { %2240 = vrcp.f32 %v1228_v9  ;;  %v1229_v8 = vadd.f32 1.0, %v2237_v4  ;;  %v2959_v9 = vld [vmem:[#allocation3 + $0x6c] ss:$16 sps:$4 sm:$0xff]   ;;  %v2965_v4 = vld [vmem:[#allocation3 + $0x68] ss:$16 sps:$4 sm:$0xff]  }
 0x44a   : > { %2242 = vrcp.f32 %v1229_v8  ;;  %v2977_v8 = vld [vmem:[#allocation3 + $0x88] ss:$16 sps:$4 sm:$0xff]  }
 0x451   : > { %v2239_v63 = vpop.eup %2238 }
 0x452   : > { %v1238_v49 = vmul.f32 %v2239_v63, %v2235_v29  ;;  %v2241_v60 = vpop.eup %2240  ;;  %v2962_v29 = vld [vmem:[#allocation3 + $0x60] ss:$16 sps:$4 sm:$0xff]   ;;  %v2968_v63 = vld [vmem:[#allocation3 + $0x84] ss:$16 sps:$4 sm:$0xff]  }
 0x453   : > { %v1237_v51 = vmul.f32 %v2241_v60, %v2833_v38  ;;  %v2974_v60 = vld [vmem:[#allocation3 + $0x80] ss:$16 sps:$4 sm:$0xff]  }
 0x454   : > { %v2243_v50 = vpop.eup %2242 }
 0x455   : > { %v2875_v46 = vadd.f32 %v1238_v49, %v1237_v51  ;;  %v2971_v49 = vld [vmem:[#allocation3 + $0x8c] ss:$16 sps:$4 sm:$0xff]   ;;  %v2980_v51 = vld [vmem:[#allocation3 + $0xa4] ss:$16 sps:$4 sm:$0xff]  }
 0x457   : > { %2244 = vtanh.f32 %v2875_v46 }
 0x461   : > { %v2245_v45 = vpop.eup %2244 }
 0x462   : > { %v1241_v61 = vmul.f32 %v2245_v45, %v2243_v50  ;;  %v2986_v50 = vld [vmem:[#allocation3 + $0xa0] ss:$16 sps:$4 sm:$0xff]   ;;  %v2989_v45 = vld [vmem:[#allocation3 + $0xa8] ss:$16 sps:$4 sm:$0xff]  }
 0x464   : > { %v1242_v12 = vpack.c.bf16 %v1241_v61, %v1241_v61  ;;  %v2992_v61 = vld [vmem:[#allocation3 + $0xc4] ss:$16 sps:$4 sm:$0xff]  }
 0x466   : > { %1283 = vmatmul.mubr.bf16.vlgmr.msra.gmra.mrb[32].mxu0 %v1242_v12  ;;  %1324 = vmatmul.mubr.bf16.vlgmr.msra.gmra.mrb[32].mxu1 %v1242_v12  ;;  %v2995_v12 = vld [vmem:[#allocation3 + $0xcc] ss:$16 sps:$4 sm:$0xff]  }
 0x467   : > { %1369 = vmatpush1.bf16.msra.mxu0 %v2878_v13  ;;  %1410 = vmatpush1.bf16.msra.mxu1 %v2881_v48 }
 0x468   : > { %1370 = vmatprep.subr.bf16.mxu0 %v2520_v14  ;;  %1411 = vmatprep.subr.bf16.mxu1 %v2523_v15  ;;  %v2914_v14 = vld [vmem:[#allocation3 + $0x4] ss:$16 sps:$4 sm:$0xff]   ;;  %v2917_v15 = vld [vmem:[#allocation3 + $0xc] ss:$16 sps:$4 sm:$0xff]  }
 0x469   : > { %1400 = vmatprep.mubr.bf16.mxu0 %v3149_v5  ;;  %1441 = vmatprep.mubr.bf16.mxu1 %v3149_v5 }
 0x46b   : > { %1371 = vmatpush1.bf16.msra.mxu0 %v2527_v16  ;;  %1412 = vmatpush1.bf16.msra.mxu1 %v2531_v17 }
 0x46c   : > { %1372 = vmatprep.subr.bf16.mxu0 %v2535_v18  ;;  %1413 = vmatprep.subr.bf16.mxu1 %v2540_v20  ;;  %v3155_v18 = vld [vmem:[#allocation11_spill] sm:$0xff] }
 0x46f   : > { %1373 = vmatpush1.bf16.msra.mxu0 %v2542_v21  ;;  %1414 = vmatpush1.bf16.msra.mxu1 %v2546_v22  ;;  %v3156_v21 = vld [vmem:[#allocation12_spill] sm:$0xff] }
 0x470   : > { %1374 = vmatprep.subr.bf16.mxu0 %v2550_v23  ;;  %1415 = vmatprep.subr.bf16.mxu1 %v2552_v24 }
 0x473   : > { %1375 = vmatpush1.bf16.msra.mxu0 %v2556_v25  ;;  %1416 = vmatpush1.bf16.msra.mxu1 %v2560_v26  ;;  %v3157_v25 = vld [vmem:[#allocation13_spill] sm:$0xff] }
 0x474   : > { %1376 = vmatprep.subr.bf16.mxu0 %v2564_v27  ;;  %1417 = vmatprep.subr.bf16.mxu1 %v2566_v28  ;;  %v3158_v27 = vld [vmem:[#allocation14_spill] sm:$0xff] }
 0x477   : > { %1377 = vmatpush1.bf16.msra.mxu0 %v2571_v30  ;;  %1418 = vmatpush1.bf16.msra.mxu1 %v2573_v31 }
 0x478   : > { %1378 = vmatprep.subr.bf16.mxu0 %v2577_v32  ;;  %1419 = vmatprep.subr.bf16.mxu1 %v2581_v33 }
 0x47b   : > { %1379 = vmatpush1.bf16.msra.mxu0 %v2585_v34  ;;  %1420 = vmatpush1.bf16.msra.mxu1 %v2587_v35 }
 0x47c   : > { %1380 = vmatprep.subr.bf16.mxu0 %v2591_v36  ;;  %1421 = vmatprep.subr.bf16.mxu1 %v2595_v37 }
 0x47f   : > { %1381 = vmatpush1.bf16.msra.mxu0 %v2600_v39  ;;  %1422 = vmatpush1.bf16.msra.mxu1 %v2602_v40 }
 0x480   : > { %1382 = vmatprep.subr.bf16.mxu0 %v2604_v41  ;;  %1423 = vmatprep.subr.bf16.mxu1 %v2606_v42 }
 0x483   : > { %1383 = vmatpush1.bf16.msra.mxu0 %v2616_v43  ;;  %1424 = vmatpush1.bf16.msra.mxu1 %v2618_v44 }
 0x484   : > { %1486 = vmatprep.subr.bf16.mxu0 %v2914_v14  ;;  %1527 = vmatprep.subr.bf16.mxu1 %v2917_v15 }
 0x539   : > { %v1284_v16 = vpop.f32.mrb[32].mxu0  ;;  %v1325_v17 = vpop.f32.mrb[32].mxu1 }
 0x53a   : > { %v1332_v20 = vadd.f32 %v1284_v16, %v3155_v18  ;;  %v1334_v22 = vadd.f32 %v1325_v17, %v3156_v21  ;;  %v1286_v23 = vpop.f32.mrb[33].mxu0  ;;  %v1327_v24 = vpop.f32.mrb[33].mxu1  ;;  %v2998_v16 = vld [vmem:[#allocation3 + $0xc0] ss:$16 sps:$4 sm:$0xff]   ;;  %v3001_v17 = vld [vmem:[#allocation3 + $0xc8] ss:$16 sps:$4 sm:$0xff]  }
 0x53b   : > { %v1333_v26 = vadd.f32 %v1286_v23, %v3157_v25  ;;  %v1335_v28 = vadd.f32 %v1327_v24, %v3158_v27  ;;  %v1288_v30 = vpop.f32.mrb[34].mxu0  ;;  %v1329_v31 = vpop.f32.mrb[34].mxu1  ;;  %v3004_v18 = vld [vmem:[#allocation3 + $0xe4] ss:$16 sps:$4 sm:$0xff]   ;;  %v3159_v23 = vld [vmem:[#allocation15_spill] sm:$0xff] }
 0x53c   : > { %v2025_v32 = vmul.f32 -1.442695, %v1332_v20  ;;  %v1289_v33 = vpop.f32.mrb[35].mxu0  ;;  %v1330_v34 = vpop.f32.mrb[35].mxu1  ;;  %v2027_v36 = vmul.f32 -1.442695, %v1334_v22 }
 0x53d   : > { %v2026_v35 = vmul.f32 -1.442695, %v1333_v26  ;;  %v3007_v20 = vld [vmem:[#allocation3 + $0xec] ss:$16 sps:$4 sm:$0xff]   ;;  %v3160_v25 = vld [vmem:[#allocation16_spill] sm:$0xff] }
 0x53e   : > { %2246 = vpow2.f32 %v2025_v32  ;;  %v3161_v30 = vld [vmem:[#allocation17_spill] sm:$0xff]  ;;  %v3162_v32 = vld [vmem:[#allocation18_spill] sm:$0xff] }
 0x53f   : > { %2248 = vpow2.f32 %v2026_v35 }
 0x540   : > { %2250 = vtanh.f32 %v1335_v28 }
 0x541   : > { %2252 = vpow2.f32 %v2027_v36 }
 0x548   : > { %v2247_v37 = vpop.eup %2246 }
 0x549   : > { %v1345_v39 = vadd.f32 1.0, %v2247_v37  ;;  %v2249_v40 = vpop.eup %2248 }
 0x54a   : > { %v1346_v41 = vadd.f32 1.0, %v2249_v40  ;;  %v2251_v42 = vpop.eup %2250 }
 0x54b   : > { %2254 = vrcp.f32 %v1345_v39  ;;  %v2253_v38 = vpop.eup %2252 }
 0x54c   : > { %2256 = vrcp.f32 %v1346_v41  ;;  %v1347_v54 = vadd.f32 1.0, %v2253_v38 }
 0x54e   : > { %2258 = vrcp.f32 %v1347_v54 }
 0x555   : > { %v2255_v6 = vpop.eup %2254 }
 0x556   : > { %v1356_v53 = vmul.f32 %v2255_v6, %v2251_v42  ;;  %v2257_v52 = vpop.eup %2256 }
 0x557   : > { %v1355_v56 = vmul.f32 %v2257_v52, %v2875_v46  ;;  %v2983_v46 = vld [vmem:[#allocation3 + $0xac] ss:$16 sps:$4 sm:$0xff]  }
 0x558   : > { %v2259_v0 = vpop.eup %2258 }
 0x559   : > { %v2925_v55 = vadd.f32 %v1356_v53, %v1355_v56 }
 0x55b   : > { %2260 = vtanh.f32 %v2925_v55 }
 0x565   : > { %v2261_v57 = vpop.eup %2260 }
 0x566   : > { %v1359_v58 = vmul.f32 %v2261_v57, %v2259_v0 }
 0x568   : > { %v1360_v59 = vpack.c.bf16 %v1359_v58, %v1359_v58 }
 0x56a   : > { %1401 = vmatmul.mubr.bf16.vlgmr.msra.gmra.mrb[36].mxu0 %v1360_v59  ;;  %1442 = vmatmul.mubr.bf16.vlgmr.msra.gmra.mrb[36].mxu1 %v1360_v59 }
 0x56b   : > { %1487 = vmatpush1.bf16.msra.mxu0 %v2878_v13  ;;  %1528 = vmatpush1.bf16.msra.mxu1 %v2881_v48 }
 0x56c   : > { %1488 = vmatprep.subr.bf16.mxu0 %v2930_v2  ;;  %1529 = vmatprep.subr.bf16.mxu1 %v2933_v47 }
 0x56d   : > { %1518 = vmatprep.mubr.bf16.mxu0 %v3149_v5  ;;  %1559 = vmatprep.mubr.bf16.mxu1 %v3149_v5 }
 0x56f   : > { %1489 = vmatpush1.bf16.msra.mxu0 %v2938_v62  ;;  %1530 = vmatpush1.bf16.msra.mxu1 %v2941_v1 }
 0x570   : > { %1490 = vmatprep.subr.bf16.mxu0 %v2944_v10  ;;  %1531 = vmatprep.subr.bf16.mxu1 %v2947_v11 }
 0x573   : > { %1491 = vmatpush1.bf16.msra.mxu0 %v2950_v3  ;;  %1532 = vmatpush1.bf16.msra.mxu1 %v2953_v19 }
 0x574   : > { %1492 = vmatprep.subr.bf16.mxu0 %v2956_v7  ;;  %1533 = vmatprep.subr.bf16.mxu1 %v2959_v9 }
 0x577   : > { %1493 = vmatpush1.bf16.msra.mxu0 %v2962_v29  ;;  %1534 = vmatpush1.bf16.msra.mxu1 %v2965_v4 }
 0x578   : > { %1494 = vmatprep.subr.bf16.mxu0 %v2968_v63  ;;  %1535 = vmatprep.subr.bf16.mxu1 %v2971_v49 }
 0x57b   : > { %1495 = vmatpush1.bf16.msra.mxu0 %v2974_v60  ;;  %1536 = vmatpush1.bf16.msra.mxu1 %v2977_v8 }
 0x57c   : > { %1496 = vmatprep.subr.bf16.mxu0 %v2980_v51  ;;  %1537 = vmatprep.subr.bf16.mxu1 %v2983_v46 }
 0x57f   : > { %1497 = vmatpush1.bf16.msra.mxu0 %v2986_v50  ;;  %1538 = vmatpush1.bf16.msra.mxu1 %v2989_v45 }
 0x580   : > { %1498 = vmatprep.subr.bf16.mxu0 %v2992_v61  ;;  %1539 = vmatprep.subr.bf16.mxu1 %v2995_v12 }
 0x583   : > { %1499 = vmatpush1.bf16.msra.mxu0 %v2998_v16  ;;  %1540 = vmatpush1.bf16.msra.mxu1 %v3001_v17 }
 0x584   : > { %1500 = vmatprep.subr.bf16.mxu0 %v3004_v18  ;;  %1541 = vmatprep.subr.bf16.mxu1 %v3007_v20 }
 0x587   : > { %1501 = vmatpush1.bf16.msra.mxu0 %v2616_v43  ;;  %1542 = vmatpush1.bf16.msra.mxu1 %v2618_v44 }
 0x588   : > { %1604 = vmatprep.subr.bf16.mxu0 %v2914_v14  ;;  %1645 = vmatprep.subr.bf16.mxu1 %v2917_v15 }
 0x63d   : > { %v1402_v21 = vpop.f32.mrb[36].mxu0  ;;  %v1443_v22 = vpop.f32.mrb[36].mxu1 }
 0x63e   : > { %v1450_v24 = vadd.f32 %v1402_v21, %v3159_v23  ;;  %v1452_v26 = vadd.f32 %v1443_v22, %v3160_v25  ;;  %v1404_v27 = vpop.f32.mrb[37].mxu0  ;;  %v1445_v28 = vpop.f32.mrb[37].mxu1 }
 0x63f   : > { %v1451_v31 = vadd.f32 %v1404_v27, %v3161_v30  ;;  %v1453_v33 = vadd.f32 %v1445_v28, %v3162_v32  ;;  %v1406_v34 = vpop.f32.mrb[38].mxu0  ;;  %v1447_v43 = vpop.f32.mrb[38].mxu1  ;;  %v2174_v30 = vld [vmem:[%s3116_s5] sm:$0xff]   ;;  %v2175_v32 = vld [vmem:[%s3116_s5 + $0x8] sm:$0xff]  }
 0x640   : > { %v2028_v35 = vmul.f32 -1.442695, %v1450_v24  ;;  %v1407_v44 = vpop.f32.mrb[39].mxu0  ;;  %v1448_v36 = vpop.f32.mrb[39].mxu1  ;;  %v2030_v15 = vmul.f32 -1.442695, %v1452_v26 }
 0x641   : > { %v2029_v14 = vmul.f32 -1.442695, %v1451_v31  ;;  %v2177_v34 = vld [vmem:[%s3116_s5 + $0x18] sm:$0xff]   ;;  %v1733_v43 = vpop.permute.xlu0 %1732  ;;  %v2179_v44 = vld [vmem:[%s3115_s4 + $0x8] sm:$0xff]   ;;  %v2180_v36 = vld [vmem:[%s3115_s4 + $0x10] sm:$0xff]  }
 0x642   : > { %2262 = vpow2.f32 %v2028_v35  ;;  %v2178_v35 = vld [vmem:[%s3115_s4] sm:$0xff]  }
 0x643   : > { %2264 = vpow2.f32 %v2029_v14  ;;  %v2181_v14 = vld [vmem:[%s3115_s4 + $0x18] sm:$0xff]  }
 0x644   : > { %2266 = vtanh.f32 %v1453_v33  ;;  %v2176_v33 = vld [vmem:[%s3116_s5 + $0x10] sm:$0xff]  }
 0x645   : > { %2268 = vpow2.f32 %v2030_v15 }
 0x64c   : > { %v2263_v37 = vpop.eup %2262 }
 0x64d   : > { %v1463_v39 = vadd.f32 1.0, %v2263_v37  ;;  %v2265_v40 = vpop.eup %2264 }
 0x64e   : > { %v1464_v41 = vadd.f32 1.0, %v2265_v40  ;;  %v2267_v42 = vpop.eup %2266 }
 0x64f   : > { %2270 = vrcp.f32 %v1463_v39  ;;  %v2269_v38 = vpop.eup %2268  ;;  %v3167_v39 = vld [vmem:[#allocation23_spill] sm:$0xff] }
 0x650   : > { %2272 = vrcp.f32 %v1464_v41  ;;  %v1465_v54 = vadd.f32 1.0, %v2269_v38  ;;  %v3168_v41 = vld [vmem:[#allocation24_spill] sm:$0xff] }
 0x652   : > { %2274 = vrcp.f32 %v1465_v54  ;;  %v3170_v54 = vld [vmem:[#allocation26_spill] sm:$0xff] }
 0x659   : > { %v2271_v6 = vpop.eup %2270 }
 0x65a   : > { %v1474_v53 = vmul.f32 %v2271_v6, %v2267_v42  ;;  %v2273_v52 = vpop.eup %2272 }
 0x65b   : > { %v1473_v56 = vmul.f32 %v2273_v52, %v2925_v55 }
 0x65c   : > { %v2275_v57 = vpop.eup %2274 }
 0x65d   : > { %v3019_v0 = vadd.f32 %v1474_v53, %v1473_v56  ;;  %v3169_v53 = vld [vmem:[#allocation25_spill] sm:$0xff] }
 0x65f   : > { %2276 = vtanh.f32 %v3019_v0 }
 0x669   : > { %v2277_v58 = vpop.eup %2276 }
 0x66a   : > { %v1477_v59 = vmul.f32 %v2277_v58, %v2275_v57 }
 0x66c   : > { %v1478_v21 = vpack.c.bf16 %v1477_v59, %v1477_v59 }
 0x66e   : > { %1519 = vmatmul.mubr.bf16.vlgmr.msra.gmra.mrb[40].mxu0 %v1478_v21  ;;  %1560 = vmatmul.mubr.bf16.vlgmr.msra.gmra.mrb[40].mxu1 %v1478_v21 }
 0x66f   : > { %1605 = vmatpush1.bf16.msra.mxu0 %v2878_v13  ;;  %1646 = vmatpush1.bf16.msra.mxu1 %v2881_v48  ;;  %v2341_v13 = vld [vmem:[#allocation3 + $0xe8] ss:$16 sps:$4 sm:$0xff]   ;;  %v2387_v48 = vmov 0.0  }
 0x670   : > { %1606 = vmatprep.subr.bf16.mxu0 %v2930_v2  ;;  %1647 = vmatprep.subr.bf16.mxu1 %v2933_v47  ;;  %v3163_v47 = vld [vmem:[#allocation19_spill] sm:$0xff] }
 0x671   : > { %1636 = vmatprep.mubr.bf16.mxu0 %v3149_v5  ;;  %1677 = vmatprep.mubr.bf16.mxu1 %v3149_v5  ;;  %v2340_v5 = vld [vmem:[#allocation3 + $0xe0] ss:$16 sps:$4 sm:$0xff]  }
 0x673   : > { %1607 = vmatpush1.bf16.msra.mxu0 %v2938_v62  ;;  %1648 = vmatpush1.bf16.msra.mxu1 %v2941_v1  ;;  %v3164_v1 = vld [vmem:[#allocation20_spill] sm:$0xff] }
 0x674   : > { %1608 = vmatprep.subr.bf16.mxu0 %v2944_v10  ;;  %1649 = vmatprep.subr.bf16.mxu1 %v2947_v11 }
 0x677   : > { %1609 = vmatpush1.bf16.msra.mxu0 %v2950_v3  ;;  %1650 = vmatpush1.bf16.msra.mxu1 %v2953_v19  ;;  %v3165_v19 = vld [vmem:[#allocation21_spill] sm:$0xff] }
 0x678   : > { %1610 = vmatprep.subr.bf16.mxu0 %v2956_v7  ;;  %1651 = vmatprep.subr.bf16.mxu1 %v2959_v9  ;;  %v3166_v9 = vld [vmem:[#allocation22_spill] sm:$0xff] }
 0x67b   : > { %1611 = vmatpush1.bf16.msra.mxu0 %v2962_v29  ;;  %1652 = vmatpush1.bf16.msra.mxu1 %v2965_v4 }
 0x67c   : > { %1612 = vmatprep.subr.bf16.mxu0 %v2968_v63  ;;  %1653 = vmatprep.subr.bf16.mxu1 %v2971_v49 }
 0x67f   : > { %1613 = vmatpush1.bf16.msra.mxu0 %v2974_v60  ;;  %1654 = vmatpush1.bf16.msra.mxu1 %v2977_v8 }
 0x680   : > { %1614 = vmatprep.subr.bf16.mxu0 %v2980_v51  ;;  %1655 = vmatprep.subr.bf16.mxu1 %v2983_v46 }
 0x683   : > { %1615 = vmatpush1.bf16.msra.mxu0 %v2986_v50  ;;  %1656 = vmatpush1.bf16.msra.mxu1 %v2989_v45 }
 0x684   : > { %1616 = vmatprep.subr.bf16.mxu0 %v2992_v61  ;;  %1657 = vmatprep.subr.bf16.mxu1 %v2995_v12 }
 0x687   : > { %1617 = vmatpush1.bf16.msra.mxu0 %v2998_v16  ;;  %1658 = vmatpush1.bf16.msra.mxu1 %v3001_v17 }
 0x688   : > { %1618 = vmatprep.subr.bf16.mxu0 %v3004_v18  ;;  %1659 = vmatprep.subr.bf16.mxu1 %v3007_v20 }
 0x68b   : > { %1619 = vmatpush1.bf16.msra.mxu0 %v2340_v5  ;;  %1660 = vmatpush1.bf16.msra.mxu1 %v2341_v13 }
 0x68c   : > { %2061 = vmatprep.subr.bf16.mxu0 %v2387_v48  ;;  %2073 = vmatprep.subr.bf16.mxu1 %v2387_v48 }
 0x741   : > { %v1520_v55 = vpop.f32.mrb[40].mxu0  ;;  %v1561_v2 = vpop.f32.mrb[40].mxu1 }
 0x742   : > { %v1568_v62 = vadd.f32 %v1520_v55, %v3163_v47  ;;  %v1570_v10 = vadd.f32 %v1561_v2, %v3164_v1  ;;  %v1522_v11 = vpop.f32.mrb[41].mxu0  ;;  %v1563_v3 = vpop.f32.mrb[41].mxu1 }
 0x743   : > { %v1569_v7 = vadd.f32 %v1522_v11, %v3165_v19  ;;  %v1571_v29 = vadd.f32 %v1563_v3, %v3166_v9  ;;  %v1524_v4 = vpop.f32.mrb[42].mxu0  ;;  %v1565_v63 = vpop.f32.mrb[42].mxu1 }
 0x744   : > { %v2031_v49 = vmul.f32 -1.442695, %v1568_v62  ;;  %v1525_v60 = vpop.f32.mrb[43].mxu0  ;;  %v1566_v8 = vpop.f32.mrb[43].mxu1  ;;  %v2033_v46 = vmul.f32 -1.442695, %v1570_v10 }
 0x745   : > { %v2032_v51 = vmul.f32 -1.442695, %v1569_v7 }
 0x746   : > { %2278 = vpow2.f32 %v2031_v49 }
 0x747   : > { %2280 = vpow2.f32 %v2032_v51 }
 0x748   : > { %2282 = vtanh.f32 %v1571_v29 }
 0x749   : > { %2284 = vpow2.f32 %v2033_v46 }
 0x750   : > { %v2279_v50 = vpop.eup %2278 }
 0x751   : > { %v1581_v45 = vadd.f32 1.0, %v2279_v50  ;;  %v2281_v61 = vpop.eup %2280 }
 0x752   : > { %v1582_v12 = vadd.f32 1.0, %v2281_v61  ;;  %v2283_v16 = vpop.eup %2282 }
 0x753   : > { %2286 = vrcp.f32 %v1581_v45  ;;  %v2285_v17 = vpop.eup %2284  ;;  %v2047_v45 = vld [vmem:[%s3117_s6] ss:$0 sm:$0xff] }
 0x754   : > { %2288 = vrcp.f32 %v1582_v12  ;;  %v1583_v23 = vadd.f32 1.0, %v2285_v17 }
 0x756   : > { %2290 = vrcp.f32 %v1583_v23 }
 0x75d   : > { %v2287_v18 = vpop.eup %2286 }
 0x75e   : > { %v1592_v20 = vmul.f32 %v2287_v18, %v2283_v16  ;;  %v2289_v22 = vpop.eup %2288 }
 0x75f   : > { %v1591_v24 = vmul.f32 %v2289_v22, %v3019_v0 }
 0x760   : > { %v2291_v26 = vpop.eup %2290 }
 0x761   : > { %v3059_v25 = vadd.f32 %v1592_v20, %v1591_v24 }
 0x763   : > { %2292 = vtanh.f32 %v3059_v25 }
 0x76d   : > { %v2293_v27 = vpop.eup %2292 }
 0x76e   : > { %v1595_v28 = vmul.f32 %v2293_v27, %v2291_v26 }
 0x770   : > { %v1596_v31 = vpack.c.bf16 %v1595_v28, %v1595_v28 }
 0x772   : > { %1637 = vmatmul.mubr.bf16.vlgmr.msra.gmra.mrb[44].mxu0 %v1596_v31  ;;  %1678 = vmatmul.mubr.bf16.vlgmr.msra.gmra.mrb[44].mxu1 %v1596_v31 }
 0x773   : > { %2062 = vmatpush3.bf16.msra.mxu0 %v2174_v30  ;;  %2069 = vmatprep.mubr.msk.bf16.mxu0 %vm2388_vm1, %v2387_v48 }
 0x774   : > { %2063 = vmatprep.subr.bf16.mxu0 %v2387_v48  ;;  %2081 = vmatprep.mubr.msk.bf16.mxu1 %vm2388_vm1, %v2387_v48 }
 0x775   : > { %2074 = vmatpush3.bf16.msra.mxu1 %v2178_v35 }
 0x776   : > { %2075 = vmatprep.subr.bf16.mxu1 %v2387_v48 }
 0x777   : > { %2064 = vmatpush3.bf16.msra.mxu0 %v2175_v32 }
 0x778   : > { %2065 = vmatprep.subr.bf16.mxu0 %v2387_v48 }
 0x779   : > { %2076 = vmatpush3.bf16.msra.mxu1 %v2179_v44 }
 0x77a   : > { %2077 = vmatprep.subr.bf16.mxu1 %v2387_v48 }
 0x77b   : > { %2066 = vmatpush3.bf16.msra.mxu0 %v2176_v33 }
 0x77c   : > { %2067 = vmatprep.subr.bf16.mxu0 %v2387_v48 }
 0x77d   : > { %2078 = vmatpush3.bf16.msra.mxu1 %v2180_v36 }
 0x77e   : > { %2079 = vmatprep.subr.bf16.mxu1 %v2387_v48 }
 0x77f   : > { %2068 = vmatpush3.bf16.msra.mxu0 %v2177_v34 }
 0x781   : > { %2080 = vmatpush3.bf16.msra.mxu1 %v2181_v14 }
 0x782   : > { %2070 = vmatmul.mubr.msk.bf16.vlgmr.msra.gmra.mrb[48].mxu0 %vm1758_vm2, %v1733_v43 }
 0x845   : > { %v1638_v15 = vpop.f32.mrb[44].mxu0  ;;  %v1679_v37 = vpop.f32.mrb[44].mxu1 }
 0x846   : > { %v1686_v40 = vadd.f32 %v1638_v15, %v3167_v39  ;;  %v1688_v42 = vadd.f32 %v1679_v37, %v3168_v41  ;;  %v1640_v38 = vpop.f32.mrb[45].mxu0  ;;  %v1681_v6 = vpop.f32.mrb[45].mxu1 }
 0x847   : > { %v1687_v52 = vadd.f32 %v1640_v38, %v3169_v53  ;;  %v1689_v56 = vadd.f32 %v1681_v6, %v3170_v54  ;;  %v1642_v0 = vpop.f32.mrb[46].mxu0  ;;  %v1683_v57 = vpop.f32.mrb[46].mxu1 }
 0x848   : > { %v2034_v58 = vmul.f32 -1.442695, %v1686_v40  ;;  %v1643_v59 = vpop.f32.mrb[47].mxu0  ;;  %v1684_v21 = vpop.f32.mrb[47].mxu1  ;;  %v2036_v13 = vmul.f32 -1.442695, %v1688_v42 }
 0x849   : > { %v2035_v5 = vmul.f32 -1.442695, %v1687_v52 }
 0x84a   : > { %2294 = vpow2.f32 %v2034_v58 }
 0x84b   : > { %2296 = vpow2.f32 %v2035_v5 }
 0x84c   : > { %2298 = vtanh.f32 %v1689_v56 }
 0x84d   : > { %2300 = vpow2.f32 %v2036_v13 }
 0x854   : > { %v2295_v48 = vpop.eup %2294 }
 0x855   : > { %v1699_v55 = vadd.f32 1.0, %v2295_v48  ;;  %v1796_v2 = vpop.f32.mrb[48].mxu0  ;;  %v2297_v47 = vpop.eup %2296 }
 0x856   : > { %v2071_v62 = vpop.f32.mrb[49].mxu0  ;;  %v1700_v1 = vadd.f32 1.0, %v2297_v47  ;;  %v2299_v3 = vpop.eup %2298 }
 0x857   : > { %2302 = vrcp.f32 %v1699_v55  ;;  %v1799_v10 = vpop.f32.mrb[50].mxu0  ;;  %v2301_v19 = vpop.eup %2300 }
 0x858   : > { %v2072_v11 = vpop.f32.mrb[51].mxu0  ;;  %2304 = vrcp.f32 %v1700_v1  ;;  %v1701_v4 = vadd.f32 1.0, %v2301_v19 }
 0x85a   : > { %2306 = vrcp.f32 %v1701_v4 }
 0x861   : > { %v2303_v7 = vpop.eup %2302 }
 0x862   : > { %v1710_v9 = vmul.f32 %v2303_v7, %v2299_v3  ;;  %v2305_v29 = vpop.eup %2304 }
 0x863   : > { %v1709_v63 = vmul.f32 %v2305_v29, %v3059_v25 }
 0x864   : > { %v2307_v60 = vpop.eup %2306 }
 0x865   : > { %v1711_v49 = vadd.f32 %v1710_v9, %v1709_v63 }
 0x867   : > { %2308 = vtanh.f32 %v1711_v49 }
 0x871   : > { %v2309_v8 = vpop.eup %2308 }
 0x872   : > { %v1713_v51 = vmul.f32 %v2309_v8, %v2307_v60 }
 0x874   : > { %v1714_v46 = vpack.c.bf16 %v1713_v51, %v1713_v51 }
 0x876   : > { %2082 = vmatmul.mubr.msk.bf16.vlgmr.msra.gmra.mrb[48].mxu1 %vm1758_vm2, %v1714_v46 }
 0x949   : > { %v1863_v50 = vpop.f32.mrb[48].mxu1 }
 0x94a   : > { %v1864_v61 = vadd.f32 %v1863_v50, %v1796_v2  ;;  %v2083_v12 = vpop.f32.mrb[49].mxu1 }
 0x94b   : > { %v1866_v16 = vpop.f32.mrb[50].mxu1 }
 0x94c   : > { %v1876_v17 = vadd.f32 %v2047_v45, %v1864_v61  ;;  %v2084_v18 = vpop.f32.mrb[51].mxu1 }
 0x94e   : > { %1878 = vst.msk [vmem:[%s291_s21] sm:$0xff] %vm1877_vm3, %v1876_v17 }
 0x94f PF: > { %s18_s24 = sadd.s32 1, %s2380_s24  }
 0x950   : > { %p15_p3 = scmp.ge.s32.totalorder %s18_s24, 4  }
 0x952   :  { %17 = sbr.rel (!%p15_p3) target bundleno = 1 (0x1), region = 90 }
 0x959   :  { %1898 = vsyncpa [#allocation4], 1 }
 0x95a   :  { %1900 = vsyncpa [#allocation4 + $0x1], 1 }

</bundles_post_ra>
